<compile_context>
chip_gen: v6e
topology: v6e:2x2x1
jax: 0.10.0
libtpu: 0.0.40
codegen_flags: <defaults>
</compile_context>

<pallas_src>
import functools

import jax
import jax.numpy as jnp
from jax import lax
from jax.experimental import pallas as pl
from jax.experimental.pallas import tpu as pltpu


def _round_up(x, m):
    return (x + m - 1) // m * m


def _device_kind():
    try:
        return jax.devices()[0].device_kind.lower()
    except Exception:
        return ""


def dense_lstm_kernel(x_ref, wih_ref, whh_ref, b_ref, wf_ref, bf_ref,
                      out_ref, h_ref, c_ref, gx_ref, *, seq_len, needs_mask,
                      unroll):
    # x_ref:   (Tc, Bb, D)    bf16  one time chunk of the (time-major) input
    # wih_ref: (D,  4*Hp)     bf16  input->gates weights (gate-padded, transposed)
    # whh_ref: (Hp, 4*Hp)     bf16  hidden->gates weights (gate-padded, transposed)
    # b_ref:   (1,  4*Hp)     f32   b_ih + b_hh (gate-padded)
    # wf_ref:  (1,  Hp)       f32   final linear weight (padded)
    # bf_ref:  (1, 1)         f32   final linear bias
    # out_ref: (Bb, 1)        f32
    # h_ref/c_ref: (Bb, Hp)   f32   recurrent state, carried across time chunks
    # gx_ref: (Tc*Bb, 4*Hp)   f32   hoisted input projection for this chunk
    t_chunk = pl.program_id(1)
    n_chunks = pl.num_programs(1)

    Tc, Bb, D = x_ref.shape
    Hp = whh_ref.shape[0]

    @pl.when(t_chunk == 0)
    def _():
        h_ref[...] = jnp.zeros_like(h_ref)
        c_ref[...] = jnp.zeros_like(c_ref)

    # Hoisted input projection: one MXU matmul per chunk (+ bias fold), stored
    # in VMEM scratch so the serial loop only slices it.
    x2d = x_ref[...].reshape(Tc * Bb, D)
    gx_ref[...] = jnp.dot(x2d, wih_ref[...],
                          preferred_element_type=jnp.float32) + b_ref[...]

    whh = whh_ref[...]

    def sigmoid(v):
        # one EUP op (tanh) + cheap VPU mul/add instead of exp + divide
        return 0.5 * jnp.tanh(0.5 * v) + 0.5

    def step(tt, carry):
        h, c = carry
        row = pl.multiple_of(tt * Bb, Bb)
        gates = gx_ref[pl.ds(row, Bb), :] + jnp.dot(
            h.astype(whh.dtype), whh, preferred_element_type=jnp.float32)
        i_g = sigmoid(gates[:, 0 * Hp:1 * Hp])
        f_g = sigmoid(gates[:, 1 * Hp:2 * Hp])
        g_g = jnp.tanh(gates[:, 2 * Hp:3 * Hp])
        o_g = sigmoid(gates[:, 3 * Hp:4 * Hp])
        c_new = f_g * c + i_g * g_g
        h_new = o_g * jnp.tanh(c_new)
        if needs_mask:  # only emitted when T does not divide into full chunks
            valid = (t_chunk * Tc + tt) < seq_len
            h_new = jnp.where(valid, h_new, h)
            c_new = jnp.where(valid, c_new, c)
        return (h_new, c_new)

    h, c = lax.fori_loop(0, Tc, step, (h_ref[...], c_ref[...]), unroll=unroll)
    h_ref[...] = h
    c_ref[...] = c

    @pl.when(t_chunk == n_chunks - 1)
    def _():
        # act1 = ReLU on last hidden, then final Linear(H, 1).  (Applying the
        # per-timestep linear and taking the last timestep == applying it to
        # the last hidden state.)  Lane-reduce instead of an N=1 matmul.
        h_relu = jnp.maximum(h, 0.0)
        y = jnp.sum(h_relu * wf_ref[...], axis=-1, keepdims=True) + bf_ref[...]
        out_ref[...] = y.astype(out_ref.dtype)


def init_raw_params(key, input_dim, hidden_dim):
    """Deterministic PyTorch-like init (uniform(-1/sqrt(H), 1/sqrt(H)))."""
    ks = jax.random.split(key, 6)
    s = 1.0 / jnp.sqrt(jnp.float32(hidden_dim))
    u = lambda k, shape: jax.random.uniform(k, shape, jnp.float32, -s, s)
    w_ih = u(ks[0], (4 * hidden_dim, input_dim))     # PyTorch weight_ih_l0
    w_hh = u(ks[1], (4 * hidden_dim, hidden_dim))    # PyTorch weight_hh_l0
    b_ih = u(ks[2], (4 * hidden_dim,))
    b_hh = u(ks[3], (4 * hidden_dim,))
    w_final = u(ks[4], (1, hidden_dim))              # final Linear weight
    b_final = u(ks[5], (1,))                         # final Linear bias
    return (w_ih, w_hh, b_ih, b_hh, w_final, b_final)


def prepare_params(raw_params, compute_dtype=jnp.bfloat16):
    """Pack PyTorch-layout params into the kernel layout.

    Each gate (order i,f,g,o) is placed at a lane-aligned span
    [k*Hp, k*Hp+H) with Hp = round_up(H, 128); all padding is zero, which
    keeps the padded hidden lanes exactly 0 through the whole recurrence.
    Matmul operands go to `compute_dtype` (bf16); bias / final linear stay f32.
    """
    w_ih, w_hh, b_ih, b_hh, w_final, b_final = raw_params
    H = w_hh.shape[1]
    Hp = _round_up(H, 128)

    def pack_gate_cols(w_t, dtype):
        # w_t: (X, 4H) -> (X, 4Hp) with gate k at columns [k*Hp, k*Hp+H).
        X = w_t.shape[0]
        out = jnp.zeros((X, 4 * Hp), dtype)
        for k in range(4):
            out = out.at[:, k * Hp:k * Hp + H].set(
                w_t[:, k * H:(k + 1) * H].astype(dtype))
        return out

    wih_p = pack_gate_cols(w_ih.T, compute_dtype)                       # (D, 4Hp)
    whh_p = jnp.zeros((Hp, 4 * Hp), compute_dtype).at[:H, :].set(
        pack_gate_cols(w_hh.T, compute_dtype))                          # (Hp, 4Hp)
    b_p = pack_gate_cols((b_ih + b_hh)[None, :], jnp.float32)           # (1, 4Hp)
    wf_p = jnp.zeros((1, Hp), jnp.float32).at[:, :H].set(
        w_final.astype(jnp.float32))                                    # (1, Hp)
    bf_p = b_final[None, :].astype(jnp.float32)                         # (1, 1)
    return (wih_p, whh_p, b_p, wf_p, bf_p)


def _pick_time_chunk(T, target):
    """Prefer a divisor of T near `target` so the masked tail path vanishes."""
    target = max(1, min(target, T))
    if T % target == 0:
        return target
    best = 1
    for tc in range(target, 0, -1):
        if T % tc == 0:
            best = tc
            break
    if best * 2 >= target:
        return best
    return target  # fall back to the masked-tail path


def _vmem_bytes(Tc, Bb, D, Hp, itemsize):
    Gp = 4 * Hp
    return int(
        2 * Tc * Bb * D * itemsize          # x chunk (double-buffered)
        + 2 * (D + Hp) * Gp * itemsize      # W_ih + W_hh blocks (Pallas keeps 2 bufs)
        + 2 * (Gp + Hp + 1) * 4             # bias / W_final / b_final blocks (x2)
        + 2 * Bb * 4                        # out block
        + Tc * Bb * Gp * 4                  # gx scratch (f32)
        + 2 * Bb * Hp * 4                   # h / c scratch
        + 6 * Bb * Hp * 4)                  # gate temporaries headroom


def dense_lstm_forward(x, params, *, time_chunk=16, batch_block=128):
    """x: (B, T, D) batch-first, like the PyTorch module. Returns (B,)."""
    wih_p, whh_p, b_p, wf_p, bf_p = params
    compute_dtype = wih_p.dtype
    itemsize = jnp.dtype(compute_dtype).itemsize
    B, T, D = x.shape
    Hp = whh_p.shape[0]
    Gp = 4 * Hp

    kind = _device_kind()
    is_v7 = "v7" in kind
    phys_vmem = (64 << 20) if is_v7 else (128 << 20)
    budget = int(phys_vmem * 3 // 4)            # ~48 MiB on v7x, ~96 MiB on v5e/v6e

    sub = 16 if itemsize == 2 else 8            # sublane packing multiple
    Bb = _round_up(min(batch_block, B), sub)    # batch block (fill MXU M dim)
    Bp = _round_up(B, Bb)
    if is_v7 and Bp // Bb < 2:                  # keep both TensorCores busy
        half = _round_up(max(1, (B + 1) // 2), sub)
        if sub <= half < Bb:
            Bb = half
            Bp = _round_up(B, Bb)

    Tc = _pick_time_chunk(T, time_chunk)        # time steps per chunk

    # Shrink tiles if the (double-buffer-aware) VMEM estimate blows the budget.
    while _vmem_bytes(Tc, Bb, D, Hp, itemsize) > budget and Tc > 1:
        Tc = max(1, Tc // 2)
    while _vmem_bytes(Tc, Bb, D, Hp, itemsize) > budget and Bb > sub:
        Bb = max(sub, _round_up(Bb // 2, sub))

    Bp = _round_up(B, Bb)
    Tp = _round_up(T, Tc)
    needs_mask = (Tp != T)

    # Cast to bf16 FIRST (halves the extra HBM traffic of this pass), then
    # transpose to time-major and pad batch/time.
    # TODO(synk): fold this transpose into the kernel (batch-first BlockSpec)
    # to drop the extra HBM round trip over x entirely.
    x_tm = jnp.transpose(x.astype(compute_dtype), (1, 0, 2))
    x_tm = jnp.pad(x_tm, ((0, Tp - T), (0, Bp - B), (0, 0)))

    grid = (Bp // Bb, Tp // Tc)

    est = _vmem_bytes(Tc, Bb, D, Hp, itemsize)
    vmem_limit = int(min(budget, max(2 * est, 16 << 20)))

    kernel = functools.partial(dense_lstm_kernel,
                               seq_len=T, needs_mask=needs_mask,
                               unroll=True if Tc <= 8 else 2)

    out = pl.pallas_call(
        kernel,
        out_shape=jax.ShapeDtypeStruct((Bp, 1), jnp.float32),
        grid_spec=pltpu.PrefetchScalarGridSpec(
            num_scalar_prefetch=0,
            grid=grid,
            in_specs=[
                pl.BlockSpec((Tc, Bb, D), lambda b, t: (t, b, 0)),   # x chunk
                pl.BlockSpec((D, Gp), lambda b, t: (0, 0)),          # W_ih^T
                pl.BlockSpec((Hp, Gp), lambda b, t: (0, 0)),         # W_hh^T
                pl.BlockSpec((1, Gp), lambda b, t: (0, 0)),          # bias
                pl.BlockSpec((1, Hp), lambda b, t: (0, 0)),          # W_final
                pl.BlockSpec((1, 1), lambda b, t: (0, 0)),           # b_final
            ],
            out_specs=pl.BlockSpec((Bb, 1), lambda b, t: (b, 0)),
            scratch_shapes=[pltpu.VMEM((Bb, Hp), jnp.float32),        # h
                            pltpu.VMEM((Bb, Hp), jnp.float32),        # c
                            pltpu.VMEM((Tc * Bb, Gp), jnp.float32)],  # gx
        ),
        compiler_params=pltpu.CompilerParams(
            dimension_semantics=("parallel", "arbitrary"),
            vmem_limit_bytes=vmem_limit),
    )(x_tm, wih_p, whh_p, b_p, wf_p, bf_p)
    return out[:B, 0]  # drop batch padding, squeeze(-1) -> (B,)


def ref_forward(x, raw_params, compute_dtype=jnp.bfloat16):
    """Pure-JAX reference with the same numerics (bf16 operands, f32 accum)."""
    w_ih, w_hh, b_ih, b_hh, w_final, b_final = raw_params
    H = w_hh.shape[1]
    B = x.shape[0]
    wih_t = w_ih.T.astype(compute_dtype)
    whh_t = w_hh.T.astype(compute_dtype)
    b = (b_ih + b_hh).astype(jnp.float32)[None, :]

    def step(carry, x_t):
        h, c = carry
        gates = (jnp.dot(x_t.astype(compute_dtype), wih_t,
                         preferred_element_type=jnp.float32)
                 + jnp.dot(h.astype(compute_dtype), whh_t,
                           preferred_element_type=jnp.float32)
                 + b)
        i_g = jax.nn.sigmoid(gates[:, :H])
        f_g = jax.nn.sigmoid(gates[:, H:2 * H])
        g_g = jnp.tanh(gates[:, 2 * H:3 * H])
        o_g = jax.nn.sigmoid(gates[:, 3 * H:])
        c = f_g * c + i_g * g_g
        h = o_g * jnp.tanh(c)
        return (h, c), None

    init = (jnp.zeros((B, H), jnp.float32), jnp.zeros((B, H), jnp.float32))
    x_tm = jnp.transpose(x.astype(jnp.float32), (1, 0, 2))
    (h_last, _), _ = lax.scan(step, init, x_tm)
    h_relu = jnp.maximum(h_last, 0.0)
    y = h_relu @ w_final.T.astype(jnp.float32) + b_final.astype(jnp.float32)
    return y[:, 0]


if __name__ == "__main__":
    B, T, D, H = 2, 8, 4, 32  # batch, seq, input_dim, hidden_dim

    key = jax.random.PRNGKey(0)
    k_x, k_p = jax.random.split(key)
    x = jax.random.normal(k_x, (B, T, D), dtype=jnp.float32)

    raw = init_raw_params(k_p, D, H)
    params = prepare_params(raw)                       # bf16 matmul operands

    out = jax.block_until_ready(dense_lstm_forward(x, params))
    ref = jax.block_until_ready(ref_forward(x, raw))

    assert out.shape == (B,), out.shape
    assert jnp.allclose(out, ref, atol=1e-3, rtol=1e-3), (out, ref)

    print("KERNEL_OK")
</pallas_src>

<mosaic_0001>
module attributes {stable_mosaic.version = 11 : i64} {
  func.func @dense_lstm_kernel(%arg0: i32, %arg1: i32, %arg2: memref<8x16x4xbf16, #tpu.memory_space<vmem>>, %arg3: memref<4x512xbf16, #tpu.memory_space<vmem>>, %arg4: memref<128x512xbf16, #tpu.memory_space<vmem>>, %arg5: memref<1x512xf32, #tpu.memory_space<vmem>>, %arg6: memref<1x128xf32, #tpu.memory_space<vmem>>, %arg7: memref<1x1xf32, #tpu.memory_space<vmem>>, %arg8: memref<16x1xf32, #tpu.memory_space<vmem>>, %arg9: memref<16x128xf32, #tpu.memory_space<vmem>>, %arg10: memref<16x128xf32, #tpu.memory_space<vmem>>, %arg11: memref<128x512xf32, #tpu.memory_space<vmem>>) attributes {dimension_semantics = [#tpu.dimension_semantics<parallel>, #tpu.dimension_semantics<arbitrary>], iteration_bounds = array<i64: 1, 1>, scalar_prefetch = 0 : i64, scratch_operands = 3 : i64, tpu.core_type = #tpu.core_type<tc>, window_params = [{transform_indices = @transform_0, window_bounds = array<i64: 8, 16, 4>}, {pipeline_mode = #tpu.pipeline_mode<synchronous>, transform_indices = @transform_1, window_bounds = array<i64: 4, 512>}, {pipeline_mode = #tpu.pipeline_mode<synchronous>, transform_indices = @transform_2, window_bounds = array<i64: 128, 512>}, {pipeline_mode = #tpu.pipeline_mode<synchronous>, transform_indices = @transform_3, window_bounds = array<i64: 1, 512>}, {pipeline_mode = #tpu.pipeline_mode<synchronous>, transform_indices = @transform_4, window_bounds = array<i64: 1, 128>}, {pipeline_mode = #tpu.pipeline_mode<synchronous>, transform_indices = @transform_5, window_bounds = array<i64: 1, 1>}, {transform_indices = @transform_6, window_bounds = array<i64: 16, 1>}]} {
    %c0_i32 = arith.constant 0 : i32
    %0 = arith.cmpi eq, %arg1, %c0_i32 : i32
    %1 = arith.extui %0 : i1 to i32
    %c0_i32_0 = arith.constant 0 : i32
    %2 = arith.cmpi ne, %1, %c0_i32_0 : i32
    scf.if %2 {
      %cst_117 = arith.constant 0.000000e+00 : f32
      %323 = vector.broadcast %cst_117 : f32 to vector<16x128xf32>
      %c0_118 = arith.constant 0 : index
      %c0_119 = arith.constant 0 : index
      %324 = vector.load %arg9[%c0_118, %c0_119] : memref<16x128xf32, #tpu.memory_space<vmem>>, vector<16x128xf32>
      tpu.vector_store %arg9[%c0_118, %c0_119], %323 {strides = array<i32>} : memref<16x128xf32, #tpu.memory_space<vmem>>, vector<16x128xf32>,
      %cst_120 = arith.constant 0.000000e+00 : f32
      %325 = vector.broadcast %cst_120 : f32 to vector<16x128xf32>
      %c0_121 = arith.constant 0 : index
      %c0_122 = arith.constant 0 : index
      %326 = vector.load %arg10[%c0_121, %c0_122] : memref<16x128xf32, #tpu.memory_space<vmem>>, vector<16x128xf32>
      tpu.vector_store %arg10[%c0_121, %c0_122], %325 {strides = array<i32>} : memref<16x128xf32, #tpu.memory_space<vmem>>, vector<16x128xf32>,
    } else {
    }
    %c0 = arith.constant 0 : index
    %c0_1 = arith.constant 0 : index
    %c0_2 = arith.constant 0 : index
    %3 = vector.load %arg2[%c0, %c0_1, %c0_2] : memref<8x16x4xbf16, #tpu.memory_space<vmem>>, vector<8x16x4xbf16>
    %4 = vector.shape_cast %3 : vector<8x16x4xbf16> to vector<128x4xbf16>
    %c0_3 = arith.constant 0 : index
    %c0_4 = arith.constant 0 : index
    %5 = vector.load %arg3[%c0_3, %c0_4] : memref<4x512xbf16, #tpu.memory_space<vmem>>, vector<4x512xbf16>
    %cst = arith.constant dense<0.000000e+00> : vector<128x512xf32>
    %6 = tpu.matmul %4, %5, %cst {dimension_numbers = #tpu.dot_dimension_numbers<[1], [0], [0], [1], [0, 0, 1, 1], [], []>} : vector<128x4xbf16>, vector<4x512xbf16>, vector<128x512xf32> -> vector<128x512xf32>
    %c0_5 = arith.constant 0 : index
    %c0_6 = arith.constant 0 : index
    %7 = vector.load %arg5[%c0_5, %c0_6] : memref<1x512xf32, #tpu.memory_space<vmem>>, vector<1x512xf32>
    %8 = vector.broadcast %7 : vector<1x512xf32> to vector<128x512xf32>
    %9 = arith.addf %6, %8 : vector<128x512xf32>
    %c0_7 = arith.constant 0 : index
    %c0_8 = arith.constant 0 : index
    %10 = vector.load %arg11[%c0_7, %c0_8] : memref<128x512xf32, #tpu.memory_space<vmem>>, vector<128x512xf32>
    tpu.vector_store %arg11[%c0_7, %c0_8], %9 {strides = array<i32>} : memref<128x512xf32, #tpu.memory_space<vmem>>, vector<128x512xf32>,
    %c0_9 = arith.constant 0 : index
    %c0_10 = arith.constant 0 : index
    %11 = vector.load %arg4[%c0_9, %c0_10] : memref<128x512xbf16, #tpu.memory_space<vmem>>, vector<128x512xbf16>
    %c0_11 = arith.constant 0 : index
    %c0_12 = arith.constant 0 : index
    %12 = vector.load %arg9[%c0_11, %c0_12] : memref<16x128xf32, #tpu.memory_space<vmem>>, vector<16x128xf32>
    %c0_13 = arith.constant 0 : index
    %c0_14 = arith.constant 0 : index
    %13 = vector.load %arg10[%c0_13, %c0_14] : memref<16x128xf32, #tpu.memory_space<vmem>>, vector<16x128xf32>
    %c0_i32_15 = arith.constant 0 : i32
    %c16_i32 = arith.constant 16 : i32
    %14 = arith.muli %c0_i32_15, %c16_i32 : i32
    %15 = tpu.assume_multiple %14, 16 : i32
    %16 = arith.index_cast %15 : i32 to index
    %c0_16 = arith.constant 0 : index
    %17 = vector.load %arg11[%16, %c0_16] : memref<128x512xf32, #tpu.memory_space<vmem>>, vector<16x512xf32>
    %18 = arith.truncf %12 : vector<16x128xf32> to vector<16x128xbf16>
    %cst_17 = arith.constant dense<0.000000e+00> : vector<16x512xf32>
    %19 = tpu.matmul %18, %11, %cst_17 {dimension_numbers = #tpu.dot_dimension_numbers<[1], [0], [0], [1], [0, 0, 1, 1], [], []>} : vector<16x128xbf16>, vector<128x512xbf16>, vector<16x512xf32> -> vector<16x512xf32>
    %20 = arith.addf %17, %19 : vector<16x512xf32>
    %21 = vector.extract_strided_slice %20 {offsets = [0, 0], sizes = [16, 128], strides = [1, 1]} : vector<16x512xf32> to vector<16x128xf32>
    %cst_18 = arith.constant 5.000000e-01 : f32
    %22 = vector.broadcast %cst_18 : f32 to vector<16x128xf32>
    %23 = arith.mulf %22, %21 : vector<16x128xf32>
    %24 = math.tanh %23 : vector<16x128xf32>
    %cst_19 = arith.constant 5.000000e-01 : f32
    %25 = vector.broadcast %cst_19 : f32 to vector<16x128xf32>
    %26 = arith.mulf %25, %24 : vector<16x128xf32>
    %cst_20 = arith.constant 5.000000e-01 : f32
    %27 = vector.broadcast %cst_20 : f32 to vector<16x128xf32>
    %28 = arith.addf %26, %27 : vector<16x128xf32>
    %29 = vector.extract_strided_slice %20 {offsets = [0, 128], sizes = [16, 128], strides = [1, 1]} : vector<16x512xf32> to vector<16x128xf32>
    %cst_21 = arith.constant 5.000000e-01 : f32
    %30 = vector.broadcast %cst_21 : f32 to vector<16x128xf32>
    %31 = arith.mulf %30, %29 : vector<16x128xf32>
    %32 = math.tanh %31 : vector<16x128xf32>
    %cst_22 = arith.constant 5.000000e-01 : f32
    %33 = vector.broadcast %cst_22 : f32 to vector<16x128xf32>
    %34 = arith.mulf %33, %32 : vector<16x128xf32>
    %cst_23 = arith.constant 5.000000e-01 : f32
    %35 = vector.broadcast %cst_23 : f32 to vector<16x128xf32>
    %36 = arith.addf %34, %35 : vector<16x128xf32>
    %37 = vector.extract_strided_slice %20 {offsets = [0, 256], sizes = [16, 128], strides = [1, 1]} : vector<16x512xf32> to vector<16x128xf32>
    %38 = math.tanh %37 : vector<16x128xf32>
    %39 = vector.extract_strided_slice %20 {offsets = [0, 384], sizes = [16, 128], strides = [1, 1]} : vector<16x512xf32> to vector<16x128xf32>
    %cst_24 = arith.constant 5.000000e-01 : f32
    %40 = vector.broadcast %cst_24 : f32 to vector<16x128xf32>
    %41 = arith.mulf %40, %39 : vector<16x128xf32>
    %42 = math.tanh %41 : vector<16x128xf32>
    %cst_25 = arith.constant 5.000000e-01 : f32
    %43 = vector.broadcast %cst_25 : f32 to vector<16x128xf32>
    %44 = arith.mulf %43, %42 : vector<16x128xf32>
    %cst_26 = arith.constant 5.000000e-01 : f32
    %45 = vector.broadcast %cst_26 : f32 to vector<16x128xf32>
    %46 = arith.addf %44, %45 : vector<16x128xf32>
    %47 = arith.mulf %36, %13 : vector<16x128xf32>
    %48 = arith.mulf %28, %38 : vector<16x128xf32>
    %49 = arith.addf %47, %48 : vector<16x128xf32>
    %50 = math.tanh %49 : vector<16x128xf32>
    %51 = arith.mulf %46, %50 : vector<16x128xf32>
    %c1_i32 = arith.constant 1 : i32
    %c16_i32_27 = arith.constant 16 : i32
    %52 = arith.muli %c1_i32, %c16_i32_27 : i32
    %53 = tpu.assume_multiple %52, 16 : i32
    %54 = arith.index_cast %53 : i32 to index
    %c0_28 = arith.constant 0 : index
    %55 = vector.load %arg11[%54, %c0_28] : memref<128x512xf32, #tpu.memory_space<vmem>>, vector<16x512xf32>
    %56 = arith.truncf %51 : vector<16x128xf32> to vector<16x128xbf16>
    %cst_29 = arith.constant dense<0.000000e+00> : vector<16x512xf32>
    %57 = tpu.matmul %56, %11, %cst_29 {dimension_numbers = #tpu.dot_dimension_numbers<[1], [0], [0], [1], [0, 0, 1, 1], [], []>} : vector<16x128xbf16>, vector<128x512xbf16>, vector<16x512xf32> -> vector<16x512xf32>
    %58 = arith.addf %55, %57 : vector<16x512xf32>
    %59 = vector.extract_strided_slice %58 {offsets = [0, 0], sizes = [16, 128], strides = [1, 1]} : vector<16x512xf32> to vector<16x128xf32>
    %cst_30 = arith.constant 5.000000e-01 : f32
    %60 = vector.broadcast %cst_30 : f32 to vector<16x128xf32>
    %61 = arith.mulf %60, %59 : vector<16x128xf32>
    %62 = math.tanh %61 : vector<16x128xf32>
    %cst_31 = arith.constant 5.000000e-01 : f32
    %63 = vector.broadcast %cst_31 : f32 to vector<16x128xf32>
    %64 = arith.mulf %63, %62 : vector<16x128xf32>
    %cst_32 = arith.constant 5.000000e-01 : f32
    %65 = vector.broadcast %cst_32 : f32 to vector<16x128xf32>
    %66 = arith.addf %64, %65 : vector<16x128xf32>
    %67 = vector.extract_strided_slice %58 {offsets = [0, 128], sizes = [16, 128], strides = [1, 1]} : vector<16x512xf32> to vector<16x128xf32>
    %cst_33 = arith.constant 5.000000e-01 : f32
    %68 = vector.broadcast %cst_33 : f32 to vector<16x128xf32>
    %69 = arith.mulf %68, %67 : vector<16x128xf32>
    %70 = math.tanh %69 : vector<16x128xf32>
    %cst_34 = arith.constant 5.000000e-01 : f32
    %71 = vector.broadcast %cst_34 : f32 to vector<16x128xf32>
    %72 = arith.mulf %71, %70 : vector<16x128xf32>
    %cst_35 = arith.constant 5.000000e-01 : f32
    %73 = vector.broadcast %cst_35 : f32 to vector<16x128xf32>
    %74 = arith.addf %72, %73 : vector<16x128xf32>
    %75 = vector.extract_strided_slice %58 {offsets = [0, 256], sizes = [16, 128], strides = [1, 1]} : vector<16x512xf32> to vector<16x128xf32>
    %76 = math.tanh %75 : vector<16x128xf32>
    %77 = vector.extract_strided_slice %58 {offsets = [0, 384], sizes = [16, 128], strides = [1, 1]} : vector<16x512xf32> to vector<16x128xf32>
    %cst_36 = arith.constant 5.000000e-01 : f32
    %78 = vector.broadcast %cst_36 : f32 to vector<16x128xf32>
    %79 = arith.mulf %78, %77 : vector<16x128xf32>
    %80 = math.tanh %79 : vector<16x128xf32>
    %cst_37 = arith.constant 5.000000e-01 : f32
    %81 = vector.broadcast %cst_37 : f32 to vector<16x128xf32>
    %82 = arith.mulf %81, %80 : vector<16x128xf32>
    %cst_38 = arith.constant 5.000000e-01 : f32
    %83 = vector.broadcast %cst_38 : f32 to vector<16x128xf32>
    %84 = arith.addf %82, %83 : vector<16x128xf32>
    %85 = arith.mulf %74, %49 : vector<16x128xf32>
    %86 = arith.mulf %66, %76 : vector<16x128xf32>
    %87 = arith.addf %85, %86 : vector<16x128xf32>
    %88 = math.tanh %87 : vector<16x128xf32>
    %89 = arith.mulf %84, %88 : vector<16x128xf32>
    %c2_i32 = arith.constant 2 : i32
    %c16_i32_39 = arith.constant 16 : i32
    %90 = arith.muli %c2_i32, %c16_i32_39 : i32
    %91 = tpu.assume_multiple %90, 16 : i32
    %92 = arith.index_cast %91 : i32 to index
    %c0_40 = arith.constant 0 : index
    %93 = vector.load %arg11[%92, %c0_40] : memref<128x512xf32, #tpu.memory_space<vmem>>, vector<16x512xf32>
    %94 = arith.truncf %89 : vector<16x128xf32> to vector<16x128xbf16>
    %cst_41 = arith.constant dense<0.000000e+00> : vector<16x512xf32>
    %95 = tpu.matmul %94, %11, %cst_41 {dimension_numbers = #tpu.dot_dimension_numbers<[1], [0], [0], [1], [0, 0, 1, 1], [], []>} : vector<16x128xbf16>, vector<128x512xbf16>, vector<16x512xf32> -> vector<16x512xf32>
    %96 = arith.addf %93, %95 : vector<16x512xf32>
    %97 = vector.extract_strided_slice %96 {offsets = [0, 0], sizes = [16, 128], strides = [1, 1]} : vector<16x512xf32> to vector<16x128xf32>
    %cst_42 = arith.constant 5.000000e-01 : f32
    %98 = vector.broadcast %cst_42 : f32 to vector<16x128xf32>
    %99 = arith.mulf %98, %97 : vector<16x128xf32>
    %100 = math.tanh %99 : vector<16x128xf32>
    %cst_43 = arith.constant 5.000000e-01 : f32
    %101 = vector.broadcast %cst_43 : f32 to vector<16x128xf32>
    %102 = arith.mulf %101, %100 : vector<16x128xf32>
    %cst_44 = arith.constant 5.000000e-01 : f32
    %103 = vector.broadcast %cst_44 : f32 to vector<16x128xf32>
    %104 = arith.addf %102, %103 : vector<16x128xf32>
    %105 = vector.extract_strided_slice %96 {offsets = [0, 128], sizes = [16, 128], strides = [1, 1]} : vector<16x512xf32> to vector<16x128xf32>
    %cst_45 = arith.constant 5.000000e-01 : f32
    %106 = vector.broadcast %cst_45 : f32 to vector<16x128xf32>
    %107 = arith.mulf %106, %105 : vector<16x128xf32>
    %108 = math.tanh %107 : vector<16x128xf32>
    %cst_46 = arith.constant 5.000000e-01 : f32
    %109 = vector.broadcast %cst_46 : f32 to vector<16x128xf32>
    %110 = arith.mulf %109, %108 : vector<16x128xf32>
    %cst_47 = arith.constant 5.000000e-01 : f32
    %111 = vector.broadcast %cst_47 : f32 to vector<16x128xf32>
    %112 = arith.addf %110, %111 : vector<16x128xf32>
    %113 = vector.extract_strided_slice %96 {offsets = [0, 256], sizes = [16, 128], strides = [1, 1]} : vector<16x512xf32> to vector<16x128xf32>
    %114 = math.tanh %113 : vector<16x128xf32>
    %115 = vector.extract_strided_slice %96 {offsets = [0, 384], sizes = [16, 128], strides = [1, 1]} : vector<16x512xf32> to vector<16x128xf32>
    %cst_48 = arith.constant 5.000000e-01 : f32
    %116 = vector.broadcast %cst_48 : f32 to vector<16x128xf32>
    %117 = arith.mulf %116, %115 : vector<16x128xf32>
    %118 = math.tanh %117 : vector<16x128xf32>
    %cst_49 = arith.constant 5.000000e-01 : f32
    %119 = vector.broadcast %cst_49 : f32 to vector<16x128xf32>
    %120 = arith.mulf %119, %118 : vector<16x128xf32>
    %cst_50 = arith.constant 5.000000e-01 : f32
    %121 = vector.broadcast %cst_50 : f32 to vector<16x128xf32>
    %122 = arith.addf %120, %121 : vector<16x128xf32>
    %123 = arith.mulf %112, %87 : vector<16x128xf32>
    %124 = arith.mulf %104, %114 : vector<16x128xf32>
    %125 = arith.addf %123, %124 : vector<16x128xf32>
    %126 = math.tanh %125 : vector<16x128xf32>
    %127 = arith.mulf %122, %126 : vector<16x128xf32>
    %c3_i32 = arith.constant 3 : i32
    %c16_i32_51 = arith.constant 16 : i32
    %128 = arith.muli %c3_i32, %c16_i32_51 : i32
    %129 = tpu.assume_multiple %128, 16 : i32
    %130 = arith.index_cast %129 : i32 to index
    %c0_52 = arith.constant 0 : index
    %131 = vector.load %arg11[%130, %c0_52] : memref<128x512xf32, #tpu.memory_space<vmem>>, vector<16x512xf32>
    %132 = arith.truncf %127 : vector<16x128xf32> to vector<16x128xbf16>
    %cst_53 = arith.constant dense<0.000000e+00> : vector<16x512xf32>
    %133 = tpu.matmul %132, %11, %cst_53 {dimension_numbers = #tpu.dot_dimension_numbers<[1], [0], [0], [1], [0, 0, 1, 1], [], []>} : vector<16x128xbf16>, vector<128x512xbf16>, vector<16x512xf32> -> vector<16x512xf32>
    %134 = arith.addf %131, %133 : vector<16x512xf32>
    %135 = vector.extract_strided_slice %134 {offsets = [0, 0], sizes = [16, 128], strides = [1, 1]} : vector<16x512xf32> to vector<16x128xf32>
    %cst_54 = arith.constant 5.000000e-01 : f32
    %136 = vector.broadcast %cst_54 : f32 to vector<16x128xf32>
    %137 = arith.mulf %136, %135 : vector<16x128xf32>
    %138 = math.tanh %137 : vector<16x128xf32>
    %cst_55 = arith.constant 5.000000e-01 : f32
    %139 = vector.broadcast %cst_55 : f32 to vector<16x128xf32>
    %140 = arith.mulf %139, %138 : vector<16x128xf32>
    %cst_56 = arith.constant 5.000000e-01 : f32
    %141 = vector.broadcast %cst_56 : f32 to vector<16x128xf32>
    %142 = arith.addf %140, %141 : vector<16x128xf32>
    %143 = vector.extract_strided_slice %134 {offsets = [0, 128], sizes = [16, 128], strides = [1, 1]} : vector<16x512xf32> to vector<16x128xf32>
    %cst_57 = arith.constant 5.000000e-01 : f32
    %144 = vector.broadcast %cst_57 : f32 to vector<16x128xf32>
    %145 = arith.mulf %144, %143 : vector<16x128xf32>
    %146 = math.tanh %145 : vector<16x128xf32>
    %cst_58 = arith.constant 5.000000e-01 : f32
    %147 = vector.broadcast %cst_58 : f32 to vector<16x128xf32>
    %148 = arith.mulf %147, %146 : vector<16x128xf32>
    %cst_59 = arith.constant 5.000000e-01 : f32
    %149 = vector.broadcast %cst_59 : f32 to vector<16x128xf32>
    %150 = arith.addf %148, %149 : vector<16x128xf32>
    %151 = vector.extract_strided_slice %134 {offsets = [0, 256], sizes = [16, 128], strides = [1, 1]} : vector<16x512xf32> to vector<16x128xf32>
    %152 = math.tanh %151 : vector<16x128xf32>
    %153 = vector.extract_strided_slice %134 {offsets = [0, 384], sizes = [16, 128], strides = [1, 1]} : vector<16x512xf32> to vector<16x128xf32>
    %cst_60 = arith.constant 5.000000e-01 : f32
    %154 = vector.broadcast %cst_60 : f32 to vector<16x128xf32>
    %155 = arith.mulf %154, %153 : vector<16x128xf32>
    %156 = math.tanh %155 : vector<16x128xf32>
    %cst_61 = arith.constant 5.000000e-01 : f32
    %157 = vector.broadcast %cst_61 : f32 to vector<16x128xf32>
    %158 = arith.mulf %157, %156 : vector<16x128xf32>
    %cst_62 = arith.constant 5.000000e-01 : f32
    %159 = vector.broadcast %cst_62 : f32 to vector<16x128xf32>
    %160 = arith.addf %158, %159 : vector<16x128xf32>
    %161 = arith.mulf %150, %125 : vector<16x128xf32>
    %162 = arith.mulf %142, %152 : vector<16x128xf32>
    %163 = arith.addf %161, %162 : vector<16x128xf32>
    %164 = math.tanh %163 : vector<16x128xf32>
    %165 = arith.mulf %160, %164 : vector<16x128xf32>
    %c4_i32 = arith.constant 4 : i32
    %c16_i32_63 = arith.constant 16 : i32
    %166 = arith.muli %c4_i32, %c16_i32_63 : i32
    %167 = tpu.assume_multiple %166, 16 : i32
    %168 = arith.index_cast %167 : i32 to index
    %c0_64 = arith.constant 0 : index
    %169 = vector.load %arg11[%168, %c0_64] : memref<128x512xf32, #tpu.memory_space<vmem>>, vector<16x512xf32>
    %170 = arith.truncf %165 : vector<16x128xf32> to vector<16x128xbf16>
    %cst_65 = arith.constant dense<0.000000e+00> : vector<16x512xf32>
    %171 = tpu.matmul %170, %11, %cst_65 {dimension_numbers = #tpu.dot_dimension_numbers<[1], [0], [0], [1], [0, 0, 1, 1], [], []>} : vector<16x128xbf16>, vector<128x512xbf16>, vector<16x512xf32> -> vector<16x512xf32>
    %172 = arith.addf %169, %171 : vector<16x512xf32>
    %173 = vector.extract_strided_slice %172 {offsets = [0, 0], sizes = [16, 128], strides = [1, 1]} : vector<16x512xf32> to vector<16x128xf32>
    %cst_66 = arith.constant 5.000000e-01 : f32
    %174 = vector.broadcast %cst_66 : f32 to vector<16x128xf32>
    %175 = arith.mulf %174, %173 : vector<16x128xf32>
    %176 = math.tanh %175 : vector<16x128xf32>
    %cst_67 = arith.constant 5.000000e-01 : f32
    %177 = vector.broadcast %cst_67 : f32 to vector<16x128xf32>
    %178 = arith.mulf %177, %176 : vector<16x128xf32>
    %cst_68 = arith.constant 5.000000e-01 : f32
    %179 = vector.broadcast %cst_68 : f32 to vector<16x128xf32>
    %180 = arith.addf %178, %179 : vector<16x128xf32>
    %181 = vector.extract_strided_slice %172 {offsets = [0, 128], sizes = [16, 128], strides = [1, 1]} : vector<16x512xf32> to vector<16x128xf32>
    %cst_69 = arith.constant 5.000000e-01 : f32
    %182 = vector.broadcast %cst_69 : f32 to vector<16x128xf32>
    %183 = arith.mulf %182, %181 : vector<16x128xf32>
    %184 = math.tanh %183 : vector<16x128xf32>
    %cst_70 = arith.constant 5.000000e-01 : f32
    %185 = vector.broadcast %cst_70 : f32 to vector<16x128xf32>
    %186 = arith.mulf %185, %184 : vector<16x128xf32>
    %cst_71 = arith.constant 5.000000e-01 : f32
    %187 = vector.broadcast %cst_71 : f32 to vector<16x128xf32>
    %188 = arith.addf %186, %187 : vector<16x128xf32>
    %189 = vector.extract_strided_slice %172 {offsets = [0, 256], sizes = [16, 128], strides = [1, 1]} : vector<16x512xf32> to vector<16x128xf32>
    %190 = math.tanh %189 : vector<16x128xf32>
    %191 = vector.extract_strided_slice %172 {offsets = [0, 384], sizes = [16, 128], strides = [1, 1]} : vector<16x512xf32> to vector<16x128xf32>
    %cst_72 = arith.constant 5.000000e-01 : f32
    %192 = vector.broadcast %cst_72 : f32 to vector<16x128xf32>
    %193 = arith.mulf %192, %191 : vector<16x128xf32>
    %194 = math.tanh %193 : vector<16x128xf32>
    %cst_73 = arith.constant 5.000000e-01 : f32
    %195 = vector.broadcast %cst_73 : f32 to vector<16x128xf32>
    %196 = arith.mulf %195, %194 : vector<16x128xf32>
    %cst_74 = arith.constant 5.000000e-01 : f32
    %197 = vector.broadcast %cst_74 : f32 to vector<16x128xf32>
    %198 = arith.addf %196, %197 : vector<16x128xf32>
    %199 = arith.mulf %188, %163 : vector<16x128xf32>
    %200 = arith.mulf %180, %190 : vector<16x128xf32>
    %201 = arith.addf %199, %200 : vector<16x128xf32>
    %202 = math.tanh %201 : vector<16x128xf32>
    %203 = arith.mulf %198, %202 : vector<16x128xf32>
    %c5_i32 = arith.constant 5 : i32
    %c16_i32_75 = arith.constant 16 : i32
    %204 = arith.muli %c5_i32, %c16_i32_75 : i32
    %205 = tpu.assume_multiple %204, 16 : i32
    %206 = arith.index_cast %205 : i32 to index
    %c0_76 = arith.constant 0 : index
    %207 = vector.load %arg11[%206, %c0_76] : memref<128x512xf32, #tpu.memory_space<vmem>>, vector<16x512xf32>
    %208 = arith.truncf %203 : vector<16x128xf32> to vector<16x128xbf16>
    %cst_77 = arith.constant dense<0.000000e+00> : vector<16x512xf32>
    %209 = tpu.matmul %208, %11, %cst_77 {dimension_numbers = #tpu.dot_dimension_numbers<[1], [0], [0], [1], [0, 0, 1, 1], [], []>} : vector<16x128xbf16>, vector<128x512xbf16>, vector<16x512xf32> -> vector<16x512xf32>
    %210 = arith.addf %207, %209 : vector<16x512xf32>
    %211 = vector.extract_strided_slice %210 {offsets = [0, 0], sizes = [16, 128], strides = [1, 1]} : vector<16x512xf32> to vector<16x128xf32>
    %cst_78 = arith.constant 5.000000e-01 : f32
    %212 = vector.broadcast %cst_78 : f32 to vector<16x128xf32>
    %213 = arith.mulf %212, %211 : vector<16x128xf32>
    %214 = math.tanh %213 : vector<16x128xf32>
    %cst_79 = arith.constant 5.000000e-01 : f32
    %215 = vector.broadcast %cst_79 : f32 to vector<16x128xf32>
    %216 = arith.mulf %215, %214 : vector<16x128xf32>
    %cst_80 = arith.constant 5.000000e-01 : f32
    %217 = vector.broadcast %cst_80 : f32 to vector<16x128xf32>
    %218 = arith.addf %216, %217 : vector<16x128xf32>
    %219 = vector.extract_strided_slice %210 {offsets = [0, 128], sizes = [16, 128], strides = [1, 1]} : vector<16x512xf32> to vector<16x128xf32>
    %cst_81 = arith.constant 5.000000e-01 : f32
    %220 = vector.broadcast %cst_81 : f32 to vector<16x128xf32>
    %221 = arith.mulf %220, %219 : vector<16x128xf32>
    %222 = math.tanh %221 : vector<16x128xf32>
    %cst_82 = arith.constant 5.000000e-01 : f32
    %223 = vector.broadcast %cst_82 : f32 to vector<16x128xf32>
    %224 = arith.mulf %223, %222 : vector<16x128xf32>
    %cst_83 = arith.constant 5.000000e-01 : f32
    %225 = vector.broadcast %cst_83 : f32 to vector<16x128xf32>
    %226 = arith.addf %224, %225 : vector<16x128xf32>
    %227 = vector.extract_strided_slice %210 {offsets = [0, 256], sizes = [16, 128], strides = [1, 1]} : vector<16x512xf32> to vector<16x128xf32>
    %228 = math.tanh %227 : vector<16x128xf32>
    %229 = vector.extract_strided_slice %210 {offsets = [0, 384], sizes = [16, 128], strides = [1, 1]} : vector<16x512xf32> to vector<16x128xf32>
    %cst_84 = arith.constant 5.000000e-01 : f32
    %230 = vector.broadcast %cst_84 : f32 to vector<16x128xf32>
    %231 = arith.mulf %230, %229 : vector<16x128xf32>
    %232 = math.tanh %231 : vector<16x128xf32>
    %cst_85 = arith.constant 5.000000e-01 : f32
    %233 = vector.broadcast %cst_85 : f32 to vector<16x128xf32>
    %234 = arith.mulf %233, %232 : vector<16x128xf32>
    %cst_86 = arith.constant 5.000000e-01 : f32
    %235 = vector.broadcast %cst_86 : f32 to vector<16x128xf32>
    %236 = arith.addf %234, %235 : vector<16x128xf32>
    %237 = arith.mulf %226, %201 : vector<16x128xf32>
    %238 = arith.mulf %218, %228 : vector<16x128xf32>
    %239 = arith.addf %237, %238 : vector<16x128xf32>
    %240 = math.tanh %239 : vector<16x128xf32>
    %241 = arith.mulf %236, %240 : vector<16x128xf32>
    %c6_i32 = arith.constant 6 : i32
    %c16_i32_87 = arith.constant 16 : i32
    %242 = arith.muli %c6_i32, %c16_i32_87 : i32
    %243 = tpu.assume_multiple %242, 16 : i32
    %244 = arith.index_cast %243 : i32 to index
    %c0_88 = arith.constant 0 : index
    %245 = vector.load %arg11[%244, %c0_88] : memref<128x512xf32, #tpu.memory_space<vmem>>, vector<16x512xf32>
    %246 = arith.truncf %241 : vector<16x128xf32> to vector<16x128xbf16>
    %cst_89 = arith.constant dense<0.000000e+00> : vector<16x512xf32>
    %247 = tpu.matmul %246, %11, %cst_89 {dimension_numbers = #tpu.dot_dimension_numbers<[1], [0], [0], [1], [0, 0, 1, 1], [], []>} : vector<16x128xbf16>, vector<128x512xbf16>, vector<16x512xf32> -> vector<16x512xf32>
    %248 = arith.addf %245, %247 : vector<16x512xf32>
    %249 = vector.extract_strided_slice %248 {offsets = [0, 0], sizes = [16, 128], strides = [1, 1]} : vector<16x512xf32> to vector<16x128xf32>
    %cst_90 = arith.constant 5.000000e-01 : f32
    %250 = vector.broadcast %cst_90 : f32 to vector<16x128xf32>
    %251 = arith.mulf %250, %249 : vector<16x128xf32>
    %252 = math.tanh %251 : vector<16x128xf32>
    %cst_91 = arith.constant 5.000000e-01 : f32
    %253 = vector.broadcast %cst_91 : f32 to vector<16x128xf32>
    %254 = arith.mulf %253, %252 : vector<16x128xf32>
    %cst_92 = arith.constant 5.000000e-01 : f32
    %255 = vector.broadcast %cst_92 : f32 to vector<16x128xf32>
    %256 = arith.addf %254, %255 : vector<16x128xf32>
    %257 = vector.extract_strided_slice %248 {offsets = [0, 128], sizes = [16, 128], strides = [1, 1]} : vector<16x512xf32> to vector<16x128xf32>
    %cst_93 = arith.constant 5.000000e-01 : f32
    %258 = vector.broadcast %cst_93 : f32 to vector<16x128xf32>
    %259 = arith.mulf %258, %257 : vector<16x128xf32>
    %260 = math.tanh %259 : vector<16x128xf32>
    %cst_94 = arith.constant 5.000000e-01 : f32
    %261 = vector.broadcast %cst_94 : f32 to vector<16x128xf32>
    %262 = arith.mulf %261, %260 : vector<16x128xf32>
    %cst_95 = arith.constant 5.000000e-01 : f32
    %263 = vector.broadcast %cst_95 : f32 to vector<16x128xf32>
    %264 = arith.addf %262, %263 : vector<16x128xf32>
    %265 = vector.extract_strided_slice %248 {offsets = [0, 256], sizes = [16, 128], strides = [1, 1]} : vector<16x512xf32> to vector<16x128xf32>
    %266 = math.tanh %265 : vector<16x128xf32>
    %267 = vector.extract_strided_slice %248 {offsets = [0, 384], sizes = [16, 128], strides = [1, 1]} : vector<16x512xf32> to vector<16x128xf32>
    %cst_96 = arith.constant 5.000000e-01 : f32
    %268 = vector.broadcast %cst_96 : f32 to vector<16x128xf32>
    %269 = arith.mulf %268, %267 : vector<16x128xf32>
    %270 = math.tanh %269 : vector<16x128xf32>
    %cst_97 = arith.constant 5.000000e-01 : f32
    %271 = vector.broadcast %cst_97 : f32 to vector<16x128xf32>
    %272 = arith.mulf %271, %270 : vector<16x128xf32>
    %cst_98 = arith.constant 5.000000e-01 : f32
    %273 = vector.broadcast %cst_98 : f32 to vector<16x128xf32>
    %274 = arith.addf %272, %273 : vector<16x128xf32>
    %275 = arith.mulf %264, %239 : vector<16x128xf32>
    %276 = arith.mulf %256, %266 : vector<16x128xf32>
    %277 = arith.addf %275, %276 : vector<16x128xf32>
    %278 = math.tanh %277 : vector<16x128xf32>
    %279 = arith.mulf %274, %278 : vector<16x128xf32>
    %c7_i32 = arith.constant 7 : i32
    %c16_i32_99 = arith.constant 16 : i32
    %280 = arith.muli %c7_i32, %c16_i32_99 : i32
    %281 = tpu.assume_multiple %280, 16 : i32
    %282 = arith.index_cast %281 : i32 to index
    %c0_100 = arith.constant 0 : index
    %283 = vector.load %arg11[%282, %c0_100] : memref<128x512xf32, #tpu.memory_space<vmem>>, vector<16x512xf32>
    %284 = arith.truncf %279 : vector<16x128xf32> to vector<16x128xbf16>
    %cst_101 = arith.constant dense<0.000000e+00> : vector<16x512xf32>
    %285 = tpu.matmul %284, %11, %cst_101 {dimension_numbers = #tpu.dot_dimension_numbers<[1], [0], [0], [1], [0, 0, 1, 1], [], []>} : vector<16x128xbf16>, vector<128x512xbf16>, vector<16x512xf32> -> vector<16x512xf32>
    %286 = arith.addf %283, %285 : vector<16x512xf32>
    %287 = vector.extract_strided_slice %286 {offsets = [0, 0], sizes = [16, 128], strides = [1, 1]} : vector<16x512xf32> to vector<16x128xf32>
    %cst_102 = arith.constant 5.000000e-01 : f32
    %288 = vector.broadcast %cst_102 : f32 to vector<16x128xf32>
    %289 = arith.mulf %288, %287 : vector<16x128xf32>
    %290 = math.tanh %289 : vector<16x128xf32>
    %cst_103 = arith.constant 5.000000e-01 : f32
    %291 = vector.broadcast %cst_103 : f32 to vector<16x128xf32>
    %292 = arith.mulf %291, %290 : vector<16x128xf32>
    %cst_104 = arith.constant 5.000000e-01 : f32
    %293 = vector.broadcast %cst_104 : f32 to vector<16x128xf32>
    %294 = arith.addf %292, %293 : vector<16x128xf32>
    %295 = vector.extract_strided_slice %286 {offsets = [0, 128], sizes = [16, 128], strides = [1, 1]} : vector<16x512xf32> to vector<16x128xf32>
    %cst_105 = arith.constant 5.000000e-01 : f32
    %296 = vector.broadcast %cst_105 : f32 to vector<16x128xf32>
    %297 = arith.mulf %296, %295 : vector<16x128xf32>
    %298 = math.tanh %297 : vector<16x128xf32>
    %cst_106 = arith.constant 5.000000e-01 : f32
    %299 = vector.broadcast %cst_106 : f32 to vector<16x128xf32>
    %300 = arith.mulf %299, %298 : vector<16x128xf32>
    %cst_107 = arith.constant 5.000000e-01 : f32
    %301 = vector.broadcast %cst_107 : f32 to vector<16x128xf32>
    %302 = arith.addf %300, %301 : vector<16x128xf32>
    %303 = vector.extract_strided_slice %286 {offsets = [0, 256], sizes = [16, 128], strides = [1, 1]} : vector<16x512xf32> to vector<16x128xf32>
    %304 = math.tanh %303 : vector<16x128xf32>
    %305 = vector.extract_strided_slice %286 {offsets = [0, 384], sizes = [16, 128], strides = [1, 1]} : vector<16x512xf32> to vector<16x128xf32>
    %cst_108 = arith.constant 5.000000e-01 : f32
    %306 = vector.broadcast %cst_108 : f32 to vector<16x128xf32>
    %307 = arith.mulf %306, %305 : vector<16x128xf32>
    %308 = math.tanh %307 : vector<16x128xf32>
    %cst_109 = arith.constant 5.000000e-01 : f32
    %309 = vector.broadcast %cst_109 : f32 to vector<16x128xf32>
    %310 = arith.mulf %309, %308 : vector<16x128xf32>
    %cst_110 = arith.constant 5.000000e-01 : f32
    %311 = vector.broadcast %cst_110 : f32 to vector<16x128xf32>
    %312 = arith.addf %310, %311 : vector<16x128xf32>
    %313 = arith.mulf %302, %277 : vector<16x128xf32>
    %314 = arith.mulf %294, %304 : vector<16x128xf32>
    %315 = arith.addf %313, %314 : vector<16x128xf32>
    %316 = math.tanh %315 : vector<16x128xf32>
    %317 = arith.mulf %312, %316 : vector<16x128xf32>
    %c8_i32 = arith.constant 8 : i32
    %c0_111 = arith.constant 0 : index
    %c0_112 = arith.constant 0 : index
    %318 = vector.load %arg9[%c0_111, %c0_112] : memref<16x128xf32, #tpu.memory_space<vmem>>, vector<16x128xf32>
    tpu.vector_store %arg9[%c0_111, %c0_112], %317 {strides = array<i32>} : memref<16x128xf32, #tpu.memory_space<vmem>>, vector<16x128xf32>,
    %c0_113 = arith.constant 0 : index
    %c0_114 = arith.constant 0 : index
    %319 = vector.load %arg10[%c0_113, %c0_114] : memref<16x128xf32, #tpu.memory_space<vmem>>, vector<16x128xf32>
    tpu.vector_store %arg10[%c0_113, %c0_114], %315 {strides = array<i32>} : memref<16x128xf32, #tpu.memory_space<vmem>>, vector<16x128xf32>,
    %c0_i32_115 = arith.constant 0 : i32
    %320 = arith.cmpi eq, %arg1, %c0_i32_115 : i32
    %321 = arith.extui %320 : i1 to i32
    %c0_i32_116 = arith.constant 0 : i32
    %322 = arith.cmpi ne, %321, %c0_i32_116 : i32
    scf.if %322 {
      %cst_117 = arith.constant 0.000000e+00 : f32
      %323 = vector.broadcast %cst_117 : f32 to vector<16x128xf32>
      %324 = arith.maximumf %317, %323 : vector<16x128xf32>
      %c0_118 = arith.constant 0 : index
      %c0_119 = arith.constant 0 : index
      %325 = vector.load %arg6[%c0_118, %c0_119] : memref<1x128xf32, #tpu.memory_space<vmem>>, vector<1x128xf32>
      %326 = vector.broadcast %325 : vector<1x128xf32> to vector<16x128xf32>
      %327 = arith.mulf %324, %326 : vector<16x128xf32>
      %cst_120 = arith.constant dense<0.000000e+00> : vector<16xf32>
      %328 = vector.multi_reduction <add>, %327, %cst_120 [1] : vector<16x128xf32> to vector<16xf32>
      %329 = vector.shape_cast %328 : vector<16xf32> to vector<16x1xf32>
      %c0_121 = arith.constant 0 : index
      %c0_122 = arith.constant 0 : index
      %330 = vector.load %arg7[%c0_121, %c0_122] : memref<1x1xf32, #tpu.memory_space<vmem>>, vector<1x1xf32>
      %331 = vector.broadcast %330 : vector<1x1xf32> to vector<16x1xf32>
      %332 = arith.addf %329, %331 : vector<16x1xf32>
      %c0_123 = arith.constant 0 : index
      %c0_124 = arith.constant 0 : index
      %333 = vector.load %arg8[%c0_123, %c0_124] : memref<16x1xf32, #tpu.memory_space<vmem>>, vector<16x1xf32>
      tpu.vector_store %arg8[%c0_123, %c0_124], %332 {strides = array<i32>} : memref<16x1xf32, #tpu.memory_space<vmem>>, vector<16x1xf32>,
    } else {
    }
    return
  }
  func.func @transform_0(%arg0: i32, %arg1: i32) -> (i32, i32, i32) {
    %c0_i32 = arith.constant 0 : i32
    %c0_i32_0 = arith.constant 0 : i32
    return %arg1, %arg0, %c0_i32 : i32, i32, i32
  }
  func.func @transform_1(%arg0: i32, %arg1: i32) -> (i32, i32) {
    %c0_i32 = arith.constant 0 : i32
    %c0_i32_0 = arith.constant 0 : i32
    %c0_i32_1 = arith.constant 0 : i32
    return %c0_i32, %c0_i32_0 : i32, i32
  }
  func.func @transform_2(%arg0: i32, %arg1: i32) -> (i32, i32) {
    %c0_i32 = arith.constant 0 : i32
    %c0_i32_0 = arith.constant 0 : i32
    %c0_i32_1 = arith.constant 0 : i32
    return %c0_i32, %c0_i32_0 : i32, i32
  }
  func.func @transform_3(%arg0: i32, %arg1: i32) -> (i32, i32) {
    %c0_i32 = arith.constant 0 : i32
    %c0_i32_0 = arith.constant 0 : i32
    %c0_i32_1 = arith.constant 0 : i32
    return %c0_i32, %c0_i32_0 : i32, i32
  }
  func.func @transform_4(%arg0: i32, %arg1: i32) -> (i32, i32) {
    %c0_i32 = arith.constant 0 : i32
    %c0_i32_0 = arith.constant 0 : i32
    %c0_i32_1 = arith.constant 0 : i32
    return %c0_i32, %c0_i32_0 : i32, i32
  }
  func.func @transform_5(%arg0: i32, %arg1: i32) -> (i32, i32) {
    %c0_i32 = arith.constant 0 : i32
    %c0_i32_0 = arith.constant 0 : i32
    %c0_i32_1 = arith.constant 0 : i32
    return %c0_i32, %c0_i32_0 : i32, i32
  }
  func.func @transform_6(%arg0: i32, %arg1: i32) -> (i32, i32) {
    %c0_i32 = arith.constant 0 : i32
    %c0_i32_0 = arith.constant 0 : i32
    return %arg0, %c0_i32 : i32, i32
  }
}

</mosaic_0001>

<bundles_post_ra>
// kernel: tpu_custom_call.1
= control target key start
LH: loop header
LB: loop body
LE: loop exit
PB: predicated region body
PF: predicated region fallthrough
CT: control target
= control target key end

     0   :  { %s3029_s0 = inlined_call_operand.vmem [shape: bf16[8,16,4], index: 0, kind: input, shape index: {}]   ;;  %s3030_s1 = inlined_call_operand.vmem [shape: bf16[4,512], index: 1, kind: input, shape index: {}]   ;;  %s3031_s2 = inlined_call_operand.hbm [shape: bf16[128,512], index: 2, kind: input, shape index: {}]   ;;  %s3032_s3 = inlined_call_operand.vmem [shape: f32[1,512], index: 3, kind: input, shape index: {}]   ;;  %s3033_s4 = inlined_call_operand.vmem [shape: f32[1,128], index: 4, kind: input, shape index: {}]   ;;  %s3034_s5 = inlined_call_operand.<no memory space> [shape: f32[1,1], index: 5, kind: input, shape index: {}]   ;;  %s3035_s6 = inlined_call_operand.vmem [shape: f32[16,1], index: 6, kind: output, shape index: {}]  }
   0x1   :  { %v11_v0 = vstv %s3034_s5 }
   0x2   :  { %12 = vst [vmem:[#allocation5] sm:$0x1] %v11_v0 }
   0x3   :  { %13 = vsyncpa [#allocation7], 0  ;;  %s2188_s23 = smov [#allocation6]  }
   0x4   :  { %s23_s24 = sshll.u32 %s2188_s23, 4  ;;  %s24_s24 = int_to_ptr.vmem [resolvable:$true] %s23_s24 }
   0x5   :  { %s2174_s25 = scalar_lea.vmem %s24_s24, 4096  ;;  %p2179_p1 = scmp.lt.s32.totalorder %s24_s24, %s24_s24 }
   0x6   :  { %p2175_p0 = scmp.ne.s32.totalorder %s24_s24, %s2174_s25  ;;  %p2180_p2 = scmp.lt.s32.totalorder %s2174_s25, %s2174_s25 }
   0x8   :  { %p2181_p3 = por %p2180_p2, %p2179_p1 }
   0xa   :  { %p2182_p4 = pnand %p2181_p3, %p2175_p0 }
   0xc   :  { %2185 = shalt.err (!%p2182_p4)
}
   0xd   :  { %s2189_s26 = smov 256   ;;  %s2190_s27 = smov 16  }
   0xe   :  { %29 = dma.hbm_to_vmem [thread:$0]  %s3031_s2, 4096, %s24_s24, [#allocation7], %s2189_s26, %s2189_s26, %s2190_s27  }
   0xf   :  { %2186 = dma.done.wait [#allocation7], 4096  }
  0x10   :  { %2187 = vsyncadd [#allocation7], 4294963200  ;;  %v67_v1 = vlaneseq  ;;  %v2191_v2 = vmov 1983009808   ;;  %v3036_v4 = vmov 0   ;;  %v64_v8 = vld [vmem:[%s3030_s1] sm:$0xff] }
  0x11   :  { %v130_v3 = vunpack.c.l.s4 %v2191_v2  ;;  %215 = vmatprep.mubr.bf16.mxu0 %v3036_v4  ;;  %328 = vmatprep.mubr.bf16.mxu1 %v3036_v4  ;;  %vm170_vm0 = vcmask 1041408   ;;  %v128_v10 = vcombine.high %v64_v8, %v64_v8  ;;  %v2243_v14 = vld [vmem:[#allocation6 + $0xe4] ss:$16 sps:$4 sm:$0xff]   ;;  %v2248_v18 = vld [vmem:[#allocation6 + $0xe0] ss:$16 sps:$4 sm:$0xff]   ;;  %vm145_vm1 = vcmask 31744  }
  0x12   :  { %v2237_v5 = vshrl.u32 %v67_v1, 7  ;;  %v1918_v17 = vld [vmem:[%s3029_s0] sm:$0xff]   ;;  %v2255_v21 = vld [vmem:[#allocation6 + $0xe8] ss:$16 sps:$4 sm:$0xff]   ;;  %v1929_v33 = vld [vmem:[%s3029_s0 + $0x10] sm:$0xff]   ;;  %v2193_v56 = vmov 0.0|0.0  }
  0x13   :  { %v131_v6 = vunpack.c.0.s8 %v130_v3  ;;  %v2250_v19 = vld [vmem:[#allocation6 + $0xec] ss:$16 sps:$4 sm:$0xff]   ;;  %v2253_v20 = vld [vmem:[#allocation6 + $0xc4] ss:$16 sps:$4 sm:$0xff]   ;;  %v2263_v23 = vld [vmem:[#allocation6 + $0xc0] ss:$16 sps:$4 sm:$0xff]  }
  0x14   :  { %v2259_v22 = vld [vmem:[#allocation6 + $0xcc] ss:$16 sps:$4 sm:$0xff]   ;;  %v2267_v24 = vld [vmem:[#allocation6 + $0xa4] ss:$16 sps:$4 sm:$0xff]   ;;  %v2274_v26 = vld [vmem:[#allocation6 + $0xc8] ss:$16 sps:$4 sm:$0xff]  }
  0x15   :  { %v134_v7 = vsub.s32 %v131_v6, %v2237_v5  ;;  %v1922_v25 = vld [vmem:[%s3029_s0 + $0x8] sm:$0xff]   ;;  %v2280_v28 = vld [vmem:[#allocation6 + $0xa0] ss:$16 sps:$4 sm:$0xff]   ;;  %v1936_v44 = vld [vmem:[%s3029_s0 + $0x18] sm:$0xff]   ;;  %v69_v57 = vsub.s32 0, %v2237_v5  ;;  %v73_v59 = vsub.s32 1, %v2237_v5 }
  0x16   :  { %v2277_v27 = vld [vmem:[#allocation6 + $0xac] ss:$16 sps:$4 sm:$0xff]   ;;  %v2283_v29 = vld [vmem:[#allocation6 + $0x84] ss:$16 sps:$4 sm:$0xff]   ;;  %v2286_v30 = vld [vmem:[#allocation6 + $0xa8] ss:$16 sps:$4 sm:$0xff]  }
  0x17   :  { %v135_v9 = vrot.slane %v64_v8, %v134_v7  ;;  %v142_v13 = vrot.slane %v128_v10, %v134_v7  ;;  %v2290_v31 = vld [vmem:[#allocation6 + $0x8c] ss:$16 sps:$4 sm:$0xff]   ;;  %v2294_v32 = vld [vmem:[#allocation6 + $0x80] ss:$16 sps:$4 sm:$0xff]   ;;  %v2301_v34 = vld [vmem:[#allocation6 + $0x64] ss:$16 sps:$4 sm:$0xff]  }
  0x18   :  { %v2305_v35 = vld [vmem:[#allocation6 + $0x88] ss:$16 sps:$4 sm:$0xff]   ;;  %v2308_v36 = vld [vmem:[#allocation6 + $0x6c] ss:$16 sps:$4 sm:$0xff]   ;;  %v2311_v37 = vld [vmem:[#allocation6 + $0x60] ss:$16 sps:$4 sm:$0xff]  }
  0x19   :  { %v143_v11 = vcombine.high %v135_v9, %v135_v9  ;;  %v172_v12 = vsel %vm170_vm0, %v135_v9, 0  ;;  %v144_v15 = vcombine.high %v142_v13, %v142_v13  ;;  %v178_v16 = vsel %vm170_vm0, %v142_v13, 0  ;;  %v2314_v38 = vld [vmem:[#allocation6 + $0x44] ss:$16 sps:$4 sm:$0xff]   ;;  %v2317_v39 = vld [vmem:[#allocation6 + $0x68] ss:$16 sps:$4 sm:$0xff]  }
  0x1a   :  { %v2321_v40 = vld [vmem:[#allocation6 + $0x4c] ss:$16 sps:$4 sm:$0xff]   ;;  %v2325_v41 = vld [vmem:[#allocation6 + $0x40] ss:$16 sps:$4 sm:$0xff]   ;;  %v2329_v42 = vld [vmem:[#allocation6 + $0x24] ss:$16 sps:$4 sm:$0xff]  }
  0x1b   :  { %1859 = vmatprep.subr.msk.bf16.mxu0 %vm170_vm0, %v143_v11  ;;  %1868 = vmatprep.subr.msk.bf16.mxu1 %vm170_vm0, %v144_v15  ;;  %v2333_v43 = vld [vmem:[#allocation6 + $0x48] ss:$16 sps:$4 sm:$0xff]   ;;  %v2339_v45 = vld [vmem:[#allocation6 + $0x2c] ss:$16 sps:$4 sm:$0xff]   ;;  %v2342_v46 = vld [vmem:[#allocation6 + $0x20] ss:$16 sps:$4 sm:$0xff]  }
  0x1c   :  { %198 = vmatpush1.bf16.msra.mxu0 %v172_v12  ;;  %311 = vmatpush1.bf16.msra.mxu1 %v178_v16  ;;  %v2345_v47 = vld [vmem:[#allocation6 + $0x4] ss:$16 sps:$4 sm:$0xff]   ;;  %v2348_v48 = vld [vmem:[#allocation6 + $0x28] ss:$16 sps:$4 sm:$0xff]   ;;  %v2352_v49 = vld [vmem:[#allocation6 + $0xc] ss:$16 sps:$4 sm:$0xff]  }
  0x1d   :  { %681 = vmatprep.subr.bf16.mxu0 %v2243_v14  ;;  %724 = vmatprep.subr.bf16.mxu1 %v2250_v19  ;;  %v2356_v50 = vld [vmem:[#allocation6] ss:$16 sps:$4 sm:$0xff]   ;;  %v2362_v51 = vld [vmem:[#allocation6 + $0x8] ss:$16 sps:$4 sm:$0xff]   ;;  %v77_v60 = vsub.s32 2, %v2237_v5  ;;  %v81_v62 = vsub.s32 3, %v2237_v5 }
  0x1e   :  { %v1943_v52 = vld [vmem:[%s3029_s0 + $0x20] sm:$0xff]   ;;  %v1950_v53 = vld [vmem:[%s3029_s0 + $0x28] sm:$0xff]   ;;  %v1957_v54 = vld [vmem:[%s3029_s0 + $0x30] sm:$0xff]   ;;  %vm1836_vm2 = vcmask 7168  }
  0x1f   :  { %1860 = vmatmul.mubr.msk.bf16.vlgmr.msra.gmra.mxu0 %vm145_vm1, %v1918_v17  ;;  %1869 = vmatmul.mubr.msk.bf16.vlgmr.msra.gmra.mxu1 %vm145_vm1, %v1918_v17  ;;  %v1964_v55 = vld [vmem:[%s3029_s0 + $0x38] sm:$0xff]   ;;  %v65_v58 = vld [vmem:[%s3032_s3] sm:$0xf] }
  0x20   :  { %682 = vmatpush1.bf16.msra.mxu0 %v2248_v18  ;;  %225 = vmatprep.mubr.bf16.mxu0 %v3036_v4  ;;  %v2437_v61 = vrot.slane %v65_v58, %v69_v57  ;;  %v2440_v63 = vrot.slane %v65_v58, %v73_v59  ;;  %v2442_v0 = vrot.slane %v65_v58, %v77_v60 }
  0x21   :  { %683 = vmatprep.subr.bf16.mxu0 %v2253_v20  ;;  %338 = vmatprep.mubr.bf16.mxu1 %v3036_v4  ;;  %v2444_v2 = vrot.slane %v65_v58, %v81_v62 }
  0x22   :  { %725 = vmatpush1.bf16.msra.mxu1 %v2255_v21 }
  0x23   :  { %726 = vmatprep.subr.bf16.mxu1 %v2259_v22 }
  0x24   :  { %684 = vmatpush1.bf16.msra.mxu0 %v2263_v23 }
  0x25   :  { %685 = vmatprep.subr.bf16.mxu0 %v2267_v24 }
  0x26   :  { %727 = vmatpush1.bf16.msra.mxu1 %v2274_v26 }
  0x27   :  { %1861 = vmatmul.mubr.msk.bf16.gmra.mxu0 %vm145_vm1, %v1922_v25  ;;  %728 = vmatprep.subr.bf16.mxu1 %v2277_v27 }
  0x28   :  { %235 = vmatprep.mubr.bf16.mxu0 %v3036_v4  ;;  %686 = vmatpush1.bf16.msra.mxu0 %v2280_v28 }
  0x29   :  { %1870 = vmatmul.mubr.msk.bf16.gmra.mxu1 %vm145_vm1, %v1922_v25  ;;  %687 = vmatprep.subr.bf16.mxu0 %v2283_v29 }
  0x2a   :  { %348 = vmatprep.mubr.bf16.mxu1 %v3036_v4  ;;  %729 = vmatpush1.bf16.msra.mxu1 %v2286_v30 }
  0x2b   :  { %730 = vmatprep.subr.bf16.mxu1 %v2290_v31 }
  0x2c   :  { %688 = vmatpush1.bf16.msra.mxu0 %v2294_v32 }
  0x2d   :  { %689 = vmatprep.subr.bf16.mxu0 %v2301_v34 }
  0x2e   :  { %731 = vmatpush1.bf16.msra.mxu1 %v2305_v35 }
  0x2f   :  { %1862 = vmatmul.mubr.msk.bf16.gmra.mxu0 %vm145_vm1, %v1929_v33  ;;  %732 = vmatprep.subr.bf16.mxu1 %v2308_v36 }
  0x30   :  { %245 = vmatprep.mubr.bf16.mxu0 %v3036_v4  ;;  %690 = vmatpush1.bf16.msra.mxu0 %v2311_v37 }
  0x31   :  { %1871 = vmatmul.mubr.msk.bf16.gmra.mxu1 %vm145_vm1, %v1929_v33  ;;  %691 = vmatprep.subr.bf16.mxu0 %v2314_v38 }
  0x32   :  { %358 = vmatprep.mubr.bf16.mxu1 %v3036_v4  ;;  %733 = vmatpush1.bf16.msra.mxu1 %v2317_v39 }
  0x33   :  { %734 = vmatprep.subr.bf16.mxu1 %v2321_v40 }
  0x34   :  { %692 = vmatpush1.bf16.msra.mxu0 %v2325_v41 }
  0x35   :  { %693 = vmatprep.subr.bf16.mxu0 %v2329_v42 }
  0x36   :  { %735 = vmatpush1.bf16.msra.mxu1 %v2333_v43 }
  0x37   :  { %1863 = vmatmul.mubr.msk.bf16.gmra.mxu0 %vm145_vm1, %v1936_v44  ;;  %736 = vmatprep.subr.bf16.mxu1 %v2339_v45 }
  0x38   :  { %255 = vmatprep.mubr.bf16.mxu0 %v3036_v4  ;;  %694 = vmatpush1.bf16.msra.mxu0 %v2342_v46 }
  0x39   :  { %1872 = vmatmul.mubr.msk.bf16.gmra.mxu1 %vm145_vm1, %v1936_v44  ;;  %695 = vmatprep.subr.bf16.mxu0 %v2345_v47 }
  0x3a   :  { %368 = vmatprep.mubr.bf16.mxu1 %v3036_v4  ;;  %737 = vmatpush1.bf16.msra.mxu1 %v2348_v48 }
  0x3b   :  { %738 = vmatprep.subr.bf16.mxu1 %v2352_v49 }
  0x3c   :  { %696 = vmatpush1.bf16.msra.mxu0 %v2356_v50 }
  0x3d   :  { %823 = vmatprep.subr.bf16.mxu0 %v2243_v14 }
  0x3e   :  { %739 = vmatpush1.bf16.msra.mxu1 %v2362_v51 }
  0x3f   :  { %1864 = vmatmul.mubr.msk.bf16.gmra.mxu0 %vm145_vm1, %v1943_v52  ;;  %866 = vmatprep.subr.bf16.mxu1 %v2250_v19 }
  0x40   :  { %265 = vmatprep.mubr.bf16.mxu0 %v3036_v4 }
  0x41   :  { %1873 = vmatmul.mubr.msk.bf16.gmra.mxu1 %vm145_vm1, %v1943_v52 }
  0x42   :  { %378 = vmatprep.mubr.bf16.mxu1 %v3036_v4 }
  0x47   :  { %1865 = vmatmul.mubr.msk.bf16.gmra.mxu0 %vm145_vm1, %v1950_v53 }
  0x48   :  { %275 = vmatprep.mubr.bf16.mxu0 %v3036_v4 }
  0x49   :  { %1874 = vmatmul.mubr.msk.bf16.gmra.mxu1 %vm145_vm1, %v1950_v53 }
  0x4a   :  { %388 = vmatprep.mubr.bf16.mxu1 %v3036_v4 }
  0x4f   :  { %1866 = vmatmul.mubr.msk.bf16.gmra.mxu0 %vm145_vm1, %v1957_v54 }
  0x50   :  { %285 = vmatprep.mubr.bf16.mxu0 %v3036_v4 }
  0x51   :  { %1875 = vmatmul.mubr.msk.bf16.gmra.mxu1 %vm145_vm1, %v1957_v54 }
  0x52   :  { %398 = vmatprep.mubr.bf16.mxu1 %v3036_v4 }
  0x57   :  { %1867 = vmatmul.mubr.msk.bf16.gmra.mxu0 %vm145_vm1, %v1964_v55 }
  0x58   :  { %713 = vmatprep.mubr.bf16.mxu0 %v3036_v4 }
  0x59   :  { %1876 = vmatmul.mubr.msk.bf16.gmra.mxu1 %vm145_vm1, %v1964_v55 }
  0x5a   :  { %756 = vmatprep.mubr.bf16.mxu1 %v3036_v4 }
  0x5f   :  { %714 = vmatmul.mubr.bf16.vlgmr.msra.gmra.mxu0 %v2193_v56 }
  0x60   :  { %824 = vmatpush1.bf16.msra.mxu0 %v2248_v18  ;;  %855 = vmatprep.mubr.bf16.mxu0 %v3036_v4 }
  0x61   :  { %757 = vmatmul.mubr.bf16.vlgmr.msra.gmra.mxu1 %v2193_v56  ;;  %825 = vmatprep.subr.bf16.mxu0 %v2253_v20 }
  0x62   :  { %867 = vmatpush1.bf16.msra.mxu1 %v2255_v21  ;;  %898 = vmatprep.mubr.bf16.mxu1 %v3036_v4 }
  0x63   :  { %868 = vmatprep.subr.bf16.mxu1 %v2259_v22 }
  0x64   :  { %826 = vmatpush1.bf16.msra.mxu0 %v2263_v23 }
  0x65   :  { %827 = vmatprep.subr.bf16.mxu0 %v2267_v24 }
  0x66   :  { %869 = vmatpush1.bf16.msra.mxu1 %v2274_v26 }
  0x67   :  { %870 = vmatprep.subr.bf16.mxu1 %v2277_v27 }
  0x68   :  { %828 = vmatpush1.bf16.msra.mxu0 %v2280_v28 }
  0x69   :  { %829 = vmatprep.subr.bf16.mxu0 %v2283_v29 }
  0x6a   :  { %871 = vmatpush1.bf16.msra.mxu1 %v2286_v30 }
  0x6b   :  { %872 = vmatprep.subr.bf16.mxu1 %v2290_v31 }
  0x6c   :  { %830 = vmatpush1.bf16.msra.mxu0 %v2294_v32 }
  0x6d   :  { %831 = vmatprep.subr.bf16.mxu0 %v2301_v34 }
  0x6e   :  { %873 = vmatpush1.bf16.msra.mxu1 %v2305_v35 }
  0x6f   :  { %874 = vmatprep.subr.bf16.mxu1 %v2308_v36 }
  0x70   :  { %832 = vmatpush1.bf16.msra.mxu0 %v2311_v37 }
  0x71   :  { %833 = vmatprep.subr.bf16.mxu0 %v2314_v38 }
  0x72   :  { %875 = vmatpush1.bf16.msra.mxu1 %v2317_v39 }
  0x73   :  { %876 = vmatprep.subr.bf16.mxu1 %v2321_v40 }
  0x74   :  { %834 = vmatpush1.bf16.msra.mxu0 %v2325_v41 }
  0x75   :  { %835 = vmatprep.subr.bf16.mxu0 %v2329_v42 }
  0x76   :  { %877 = vmatpush1.bf16.msra.mxu1 %v2333_v43 }
  0x77   :  { %878 = vmatprep.subr.bf16.mxu1 %v2339_v45 }
  0x78   :  { %836 = vmatpush1.bf16.msra.mxu0 %v2342_v46 }
  0x79   :  { %837 = vmatprep.subr.bf16.mxu0 %v2345_v47 }
  0x7a   :  { %879 = vmatpush1.bf16.msra.mxu1 %v2348_v48 }
  0x7b   :  { %880 = vmatprep.subr.bf16.mxu1 %v2352_v49 }
  0x7c   :  { %838 = vmatpush1.bf16.msra.mxu0 %v2356_v50 }
  0x7d   :  { %965 = vmatprep.subr.bf16.mxu0 %v2243_v14 }
  0x7e   :  { %881 = vmatpush1.bf16.msra.mxu1 %v2362_v51 }
  0x7f   :  { %1008 = vmatprep.subr.bf16.mxu1 %v2250_v19 }
  0xdf   :  { %v217_v1 = vpop.f32.mrf.mxu0  ;;  %v330_v7 = vpop.f32.mrf.mxu1 }
  0xe0   :  { %v2447_v3 = vadd.f32 %v217_v1, %v2437_v61  ;;  %v2453_v9 = vadd.f32 %v330_v7, %v2442_v0 }
  0xe1   :  { %v219_v6 = vpop.f32.mrf.mxu0  ;;  %v332_v5 = vpop.f32.mrf.mxu1 }
  0xe2   :  { %v2450_v8 = vadd.f32 %v219_v6, %v2440_v63  ;;  %v2459_v12 = vadd.f32 %v332_v5, %v2444_v2 }
  0xe3   :  { %v221_v10 = vpop.f32.mrf.mxu0  ;;  %v2463_v15 = vpop.f32.mrf.mxu1 }
  0xe4   :  { %v2456_v11 = vadd.f32 %v221_v10, %v2437_v61 }
  0xe5   :  { %v2461_v13 = vpop.f32.mrf.mxu0  ;;  %v336_v17 = vpop.f32.mrf.mxu1 }
  0xe6   :  { %v2469_v33 = vadd.f32 %v336_v17, %v2444_v2 }
  0xe7   :  { %v227_v16 = vpop.f32.mrf.mxu0 }
  0xe8   :  { %v2466_v25 = vadd.f32 %v227_v16, %v2437_v61 }
  0xe9   :  { %v229_v44 = vpop.f32.mrf.mxu0  ;;  %v340_v52 = vpop.f32.mrf.mxu1 }
  0xea   :  { %v2472_v53 = vadd.f32 %v229_v44, %v2440_v63  ;;  %v2475_v54 = vadd.f32 %v340_v52, %v2442_v0 }
  0xeb   :  { %v231_v55 = vpop.f32.mrf.mxu0  ;;  %v342_v56 = vpop.f32.mrf.mxu1 }
  0xec   :  { %v2478_v57 = vadd.f32 %v231_v55, %v2437_v61  ;;  %v2481_v58 = vadd.f32 %v342_v56, %v2444_v2 }
  0xed   :  { %v233_v59 = vpop.f32.mrf.mxu0  ;;  %v344_v60 = vpop.f32.mrf.mxu1 }
  0xee   :  { %v2484_v62 = vadd.f32 %v233_v59, %v2440_v63  ;;  %v2487_v1 = vadd.f32 %v344_v60, %v2442_v0 }
  0xef   :  { %v237_v6 = vpop.f32.mrf.mxu0  ;;  %v346_v7 = vpop.f32.mrf.mxu1 }
  0xf0   :  { %v2490_v10 = vadd.f32 %v237_v6, %v2437_v61  ;;  %v2493_v5 = vadd.f32 %v346_v7, %v2444_v2 }
  0xf1   :  { %v239_v16 = vpop.f32.mrf.mxu0  ;;  %v350_v17 = vpop.f32.mrf.mxu1 }
  0xf2   :  { %3038 = vst [vmem:[#allocation9_spill] sm:$0xff] %v2490_v10  ;;  %3039 = vst [vmem:[#allocation10_spill] sm:$0xff] %v2493_v5  ;;  %v2496_v44 = vadd.f32 %v239_v16, %v2440_v63  ;;  %v2499_v52 = vadd.f32 %v350_v17, %v2442_v0 }
  0xf3   :  { %v241_v55 = vpop.f32.mrf.mxu0  ;;  %v352_v56 = vpop.f32.mrf.mxu1 }
  0xf4   :  { %3040 = vst [vmem:[#allocation11_spill] sm:$0xff] %v2496_v44  ;;  %3041 = vst [vmem:[#allocation12_spill] sm:$0xff] %v2499_v52  ;;  %v2502_v59 = vadd.f32 %v241_v55, %v2437_v61  ;;  %v2505_v60 = vadd.f32 %v352_v56, %v2444_v2 }
  0xf5   :  { %v243_v6 = vpop.f32.mrf.mxu0  ;;  %v354_v4 = vpop.f32.mrf.mxu1 }
  0xf6   :  { %3042 = vst [vmem:[#allocation13_spill] sm:$0xff] %v2502_v59  ;;  %3043 = vst [vmem:[#allocation14_spill] sm:$0xff] %v2505_v60  ;;  %v2508_v7 = vadd.f32 %v243_v6, %v2440_v63  ;;  %v2511_v10 = vadd.f32 %v354_v4, %v2442_v0 }
  0xf7   :  { %v247_v16 = vpop.f32.mrf.mxu0  ;;  %v356_v44 = vpop.f32.mrf.mxu1 }
  0xf8   :  { %3044 = vst [vmem:[#allocation15_spill] sm:$0xff] %v2508_v7  ;;  %3045 = vst [vmem:[#allocation16_spill] sm:$0xff] %v2511_v10  ;;  %v2514_v17 = vadd.f32 %v247_v16, %v2437_v61  ;;  %v2517_v52 = vadd.f32 %v356_v44, %v2444_v2 }
  0xf9   :  { %v249_v55 = vpop.f32.mrf.mxu0  ;;  %v360_v59 = vpop.f32.mrf.mxu1 }
  0xfa   :  { %3046 = vst [vmem:[#allocation17_spill] sm:$0xff] %v2514_v17  ;;  %3047 = vst [vmem:[#allocation18_spill] sm:$0xff] %v2517_v52  ;;  %v2520_v56 = vadd.f32 %v249_v55, %v2440_v63  ;;  %v2523_v60 = vadd.f32 %v360_v59, %v2442_v0 }
  0xfb   :  { %v251_v6 = vpop.f32.mrf.mxu0  ;;  %v362_v7 = vpop.f32.mrf.mxu1 }
  0xfc   :  { %3048 = vst [vmem:[#allocation19_spill] sm:$0xff] %v2520_v56  ;;  %3049 = vst [vmem:[#allocation20_spill] sm:$0xff] %v2523_v60  ;;  %v2526_v4 = vadd.f32 %v251_v6, %v2437_v61  ;;  %v2529_v10 = vadd.f32 %v362_v7, %v2444_v2 }
  0xfd   :  { %v253_v16 = vpop.f32.mrf.mxu0  ;;  %v364_v17 = vpop.f32.mrf.mxu1 }
  0xfe   :  { %3050 = vst [vmem:[#allocation21_spill] sm:$0xff] %v2526_v4  ;;  %3051 = vst [vmem:[#allocation22_spill] sm:$0xff] %v2529_v10  ;;  %v2532_v44 = vadd.f32 %v253_v16, %v2440_v63  ;;  %v2535_v52 = vadd.f32 %v364_v17, %v2442_v0 }
  0xff   :  { %v257_v55 = vpop.f32.mrf.mxu0  ;;  %v366_v56 = vpop.f32.mrf.mxu1 }
 0x100   :  { %3052 = vst [vmem:[#allocation23_spill] sm:$0xff] %v2532_v44  ;;  %3053 = vst [vmem:[#allocation24_spill] sm:$0xff] %v2535_v52  ;;  %v2538_v59 = vadd.f32 %v257_v55, %v2437_v61  ;;  %v2541_v60 = vadd.f32 %v366_v56, %v2444_v2 }
 0x101   :  { %v259_v6 = vpop.f32.mrf.mxu0  ;;  %v370_v4 = vpop.f32.mrf.mxu1 }
 0x102   :  { %3054 = vst [vmem:[#allocation25_spill] sm:$0xff] %v2538_v59  ;;  %3055 = vst [vmem:[#allocation26_spill] sm:$0xff] %v2541_v60  ;;  %v2544_v7 = vadd.f32 %v259_v6, %v2440_v63  ;;  %v2547_v10 = vadd.f32 %v370_v4, %v2442_v0 }
 0x103   :  { %v261_v16 = vpop.f32.mrf.mxu0  ;;  %v372_v44 = vpop.f32.mrf.mxu1 }
 0x104   :  { %3056 = vst [vmem:[#allocation27_spill] sm:$0xff] %v2544_v7  ;;  %3057 = vst [vmem:[#allocation28_spill] sm:$0xff] %v2547_v10  ;;  %v2550_v17 = vadd.f32 %v261_v16, %v2437_v61  ;;  %v2553_v52 = vadd.f32 %v372_v44, %v2444_v2 }
 0x105   :  { %v263_v55 = vpop.f32.mrf.mxu0  ;;  %v374_v59 = vpop.f32.mrf.mxu1 }
 0x106   :  { %3058 = vst [vmem:[#allocation29_spill] sm:$0xff] %v2550_v17  ;;  %3059 = vst [vmem:[#allocation30_spill] sm:$0xff] %v2553_v52  ;;  %v2556_v56 = vadd.f32 %v263_v55, %v2440_v63  ;;  %v2559_v60 = vadd.f32 %v374_v59, %v2442_v0 }
 0x107   :  { %v267_v6 = vpop.f32.mrf.mxu0  ;;  %v376_v7 = vpop.f32.mrf.mxu1 }
 0x108   :  { %3060 = vst [vmem:[#allocation31_spill] sm:$0xff] %v2556_v56  ;;  %3061 = vst [vmem:[#allocation32_spill] sm:$0xff] %v2559_v60  ;;  %v2562_v4 = vadd.f32 %v267_v6, %v2437_v61  ;;  %v2565_v10 = vadd.f32 %v376_v7, %v2444_v2 }
 0x109   :  { %v269_v16 = vpop.f32.mrf.mxu0  ;;  %v380_v17 = vpop.f32.mrf.mxu1 }
 0x10a   :  { %3062 = vst [vmem:[#allocation33_spill] sm:$0xff] %v2562_v4  ;;  %3063 = vst [vmem:[#allocation34_spill] sm:$0xff] %v2565_v10  ;;  %v2568_v44 = vadd.f32 %v269_v16, %v2440_v63  ;;  %v2571_v52 = vadd.f32 %v380_v17, %v2442_v0 }
 0x10b   :  { %v271_v55 = vpop.f32.mrf.mxu0  ;;  %v382_v56 = vpop.f32.mrf.mxu1 }
 0x10c   :  { %3064 = vst [vmem:[#allocation35_spill] sm:$0xff] %v2568_v44  ;;  %3065 = vst [vmem:[#allocation36_spill] sm:$0xff] %v2571_v52  ;;  %v2574_v59 = vadd.f32 %v271_v55, %v2437_v61  ;;  %v2577_v60 = vadd.f32 %v382_v56, %v2444_v2 }
 0x10d   :  { %v273_v6 = vpop.f32.mrf.mxu0  ;;  %v384_v4 = vpop.f32.mrf.mxu1 }
 0x10e   :  { %3066 = vst [vmem:[#allocation37_spill] sm:$0xff] %v2574_v59  ;;  %3067 = vst [vmem:[#allocation38_spill] sm:$0xff] %v2577_v60  ;;  %v2580_v7 = vadd.f32 %v273_v6, %v2440_v63  ;;  %v2583_v10 = vadd.f32 %v384_v4, %v2442_v0 }
 0x10f   :  { %v277_v16 = vpop.f32.mrf.mxu0  ;;  %v386_v44 = vpop.f32.mrf.mxu1 }
 0x110   :  { %3068 = vst [vmem:[#allocation39_spill] sm:$0xff] %v2580_v7  ;;  %3069 = vst [vmem:[#allocation40_spill] sm:$0xff] %v2583_v10  ;;  %v2586_v17 = vadd.f32 %v277_v16, %v2437_v61  ;;  %v2589_v52 = vadd.f32 %v386_v44, %v2444_v2 }
 0x111   :  { %v279_v55 = vpop.f32.mrf.mxu0  ;;  %v390_v59 = vpop.f32.mrf.mxu1 }
 0x112   :  { %3070 = vst [vmem:[#allocation41_spill] sm:$0xff] %v2586_v17  ;;  %3071 = vst [vmem:[#allocation42_spill] sm:$0xff] %v2589_v52  ;;  %v2592_v56 = vadd.f32 %v279_v55, %v2440_v63  ;;  %v2595_v60 = vadd.f32 %v390_v59, %v2442_v0 }
 0x113   :  { %v281_v6 = vpop.f32.mrf.mxu0  ;;  %v392_v7 = vpop.f32.mrf.mxu1 }
 0x114   :  { %3072 = vst [vmem:[#allocation43_spill] sm:$0xff] %v2592_v56  ;;  %3073 = vst [vmem:[#allocation44_spill] sm:$0xff] %v2595_v60  ;;  %v2598_v4 = vadd.f32 %v281_v6, %v2437_v61  ;;  %v2601_v10 = vadd.f32 %v392_v7, %v2444_v2 }
 0x115   :  { %v283_v16 = vpop.f32.mrf.mxu0  ;;  %v394_v17 = vpop.f32.mrf.mxu1 }
 0x116   :  { %3074 = vst [vmem:[#allocation45_spill] sm:$0xff] %v2598_v4  ;;  %3075 = vst [vmem:[#allocation46_spill] sm:$0xff] %v2601_v10  ;;  %v2604_v44 = vadd.f32 %v283_v16, %v2440_v63  ;;  %v2607_v52 = vadd.f32 %v394_v17, %v2442_v0 }
 0x117   :  { %v287_v55 = vpop.f32.mrf.mxu0  ;;  %v396_v56 = vpop.f32.mrf.mxu1 }
 0x118   :  { %3076 = vst [vmem:[#allocation47_spill] sm:$0xff] %v2604_v44  ;;  %3077 = vst [vmem:[#allocation48_spill] sm:$0xff] %v2607_v52  ;;  %v2610_v59 = vadd.f32 %v287_v55, %v2437_v61  ;;  %v2613_v60 = vadd.f32 %v396_v56, %v2444_v2 }
 0x119   :  { %v289_v6 = vpop.f32.mrf.mxu0  ;;  %v400_v4 = vpop.f32.mrf.mxu1 }
 0x11a   :  { %3078 = vst [vmem:[#allocation49_spill] sm:$0xff] %v2610_v59  ;;  %3079 = vst [vmem:[#allocation50_spill] sm:$0xff] %v2613_v60  ;;  %v2616_v7 = vadd.f32 %v289_v6, %v2440_v63  ;;  %v2619_v10 = vadd.f32 %v400_v4, %v2442_v0 }
 0x11b   :  { %v291_v16 = vpop.f32.mrf.mxu0  ;;  %v402_v44 = vpop.f32.mrf.mxu1 }
 0x11c   :  { %3080 = vst [vmem:[#allocation51_spill] sm:$0xff] %v2616_v7  ;;  %3081 = vst [vmem:[#allocation52_spill] sm:$0xff] %v2619_v10  ;;  %v2622_v17 = vadd.f32 %v291_v16, %v2437_v61  ;;  %v2625_v52 = vadd.f32 %v402_v44, %v2444_v2 }
 0x11d   :  { %v293_v55 = vpop.f32.mrf.mxu0  ;;  %v404_v59 = vpop.f32.mrf.mxu1 }
 0x11e   :  { %3082 = vst [vmem:[#allocation53_spill] sm:$0xff] %v2622_v17  ;;  %3083 = vst [vmem:[#allocation54_spill] sm:$0xff] %v2625_v52  ;;  %v2628_v56 = vadd.f32 %v293_v55, %v2440_v63  ;;  %v2631_v60 = vadd.f32 %v404_v59, %v2442_v0  ;;  %v224_v59 = vadd.f32 %v2461_v13, %v2440_v63 }
 0x11f   :  { %v406_v6 = vpop.f32.mrf.mxu1  ;;  %v715_v7 = vpop.f32.mrf.mxu0 }
 0x120   :  { %3084 = vst [vmem:[#allocation55_spill] sm:$0xff] %v2628_v56  ;;  %3085 = vst [vmem:[#allocation56_spill] sm:$0xff] %v2631_v60  ;;  %v2634_v4 = vadd.f32 %v406_v6, %v2444_v2  ;;  %v767_v10 = vadd.f32 %v715_v7, %v2447_v3  ;;  %v335_v3 = vadd.f32 %v2463_v15, %v2442_v0 }
 0x121   :  { %v717_v61 = vpop.f32.mrf.mxu0  ;;  %v758_v16 = vpop.f32.mrf.mxu1 }
 0x122   :  { %v775_v17 = vmul.f32 0.5, %v767_v10  ;;  %v768_v44 = vadd.f32 %v717_v61, %v2450_v8  ;;  %v769_v52 = vadd.f32 %v758_v16, %v2453_v9 }
 0x123   :  { %v719_v5 = vpop.f32.mrf.mxu0  ;;  %v760_v55 = vpop.f32.mrf.mxu1 }
 0x124   :  { %1974 = vtanh.f32 %v775_v17  ;;  %v783_v60 = vmul.f32 0.5, %v768_v44  ;;  %v771_v56 = vadd.f32 %v719_v5, %v2456_v11  ;;  %v770_v63 = vadd.f32 %v760_v55, %v2459_v12 }
 0x125   :  { %v721_v2 = vpop.f32.mrf.mxu0  ;;  %v762_v6 = vpop.f32.mrf.mxu1 }
 0x126   :  { %1976 = vtanh.f32 %v783_v60  ;;  %v776_v10 = vmul.f32 0.5, %v771_v56  ;;  %v772_v7 = vadd.f32 %v721_v2, %v224_v59  ;;  %v773_v9 = vadd.f32 %v762_v6, %v335_v3 }
 0x127   :  { %1978 = vtanh.f32 %v769_v52  ;;  %v764_v61 = vpop.f32.mrf.mxu1  ;;  %v793_v16 = vmul.f32 0.5, %v770_v63 }
 0x128   :  { %1980 = vtanh.f32 %v776_v10  ;;  %v784_v8 = vmul.f32 0.5, %v772_v7  ;;  %v774_v13 = vadd.f32 %v764_v61, %v2469_v33 }
 0x12a   :  { %1982 = vtanh.f32 %v784_v8  ;;  %v794_v60 = vmul.f32 0.5, %v774_v13 }
 0x12b   :  { %1984 = vtanh.f32 %v773_v9 }
 0x12c   :  { %1986 = vtanh.f32 %v793_v16 }
 0x12d   :  { %1988 = vtanh.f32 %v794_v60 }
 0x131   :  { %v1975_v11 = vpop.eup %1974 }
 0x132   :  { %v779_v5 = vmul.f32 0.5, %v1975_v11 }
 0x133   :  { %v1977_v17 = vpop.eup %1976 }
 0x134   :  { %v1979_v44 = vpop.eup %1978  ;;  %v781_v0 = vadd.f32 0.5, %v779_v5  ;;  %v787_v15 = vmul.f32 0.5, %v1977_v17 }
 0x135   :  { %v1981_v56 = vpop.eup %1980 }
 0x136   :  { %v789_v52 = vadd.f32 0.5, %v787_v15  ;;  %v803_v59 = vmul.f32 %v1979_v44, %v781_v0  ;;  %v780_v2 = vmul.f32 0.5, %v1981_v56 }
 0x137   :  { %v1983_v6 = vpop.eup %1982 }
 0x138   :  { %v801_v3 = vmul.f32 0.0, %v789_v52  ;;  %v782_v10 = vadd.f32 0.5, %v780_v2  ;;  %v788_v7 = vmul.f32 0.5, %v1983_v6  ;;  %v1985_v12 = vpop.eup %1984  ;;  %v3086_v52 = vmov 0  }
 0x139   :  { %v1987_v63 = vpop.eup %1986 }
 0x13a   :  { %v2646_v33 = vadd.f32 %v803_v59, %v801_v3  ;;  %v790_v55 = vadd.f32 0.5, %v788_v7  ;;  %v804_v8 = vmul.f32 %v1985_v12, %v782_v10  ;;  %v1989_v13 = vpop.eup %1988  ;;  %v797_v11 = vmul.f32 0.5, %v1987_v63 }
 0x13b   :  { %v798_v5 = vmul.f32 0.5, %v1989_v13 }
 0x13c   :  { %v802_v9 = vmul.f32 0.0, %v790_v55  ;;  %1990 = vtanh.f32 %v2646_v33  ;;  %v799_v16 = vadd.f32 0.5, %v797_v11 }
 0x13d   :  { %v800_v44 = vadd.f32 0.5, %v798_v5 }
 0x13e   :  { %v2649_v61 = vadd.f32 %v804_v8, %v802_v9 }
 0x140   :  { %1992 = vtanh.f32 %v2649_v61 }
 0x149   :  { %v1991_v17 = vpop.eup %1990 }
 0x14a   :  { %v809_v15 = vmul.f32 %v1991_v17, %v799_v16  ;;  %v3087_v17 = vld [vmem:[#allocation10_spill] sm:$0xff] }
 0x14d   :  { %v1993_v0 = vpop.eup %1992 }
 0x14e   :  { %v810_v60 = vmul.f32 %v1993_v0, %v800_v44 }
 0x150   :  { %v822_v56 = vpack.c.bf16 %v810_v60, %v809_v15 }
 0x152   :  { %856 = vmatmul.mubr.bf16.vlgmr.msra.gmra.mxu0 %v822_v56  ;;  %899 = vmatmul.mubr.bf16.vlgmr.msra.gmra.mxu1 %v822_v56 }
 0x153   :  { %966 = vmatpush1.bf16.msra.mxu0 %v2248_v18  ;;  %1009 = vmatpush1.bf16.msra.mxu1 %v2255_v21 }
 0x154   :  { %967 = vmatprep.subr.bf16.mxu0 %v2253_v20  ;;  %1010 = vmatprep.subr.bf16.mxu1 %v2259_v22 }
 0x155   :  { %997 = vmatprep.mubr.bf16.mxu0 %v3086_v52  ;;  %1040 = vmatprep.mubr.bf16.mxu1 %v3086_v52 }
 0x157   :  { %968 = vmatpush1.bf16.msra.mxu0 %v2263_v23  ;;  %1011 = vmatpush1.bf16.msra.mxu1 %v2274_v26 }
 0x158   :  { %969 = vmatprep.subr.bf16.mxu0 %v2267_v24  ;;  %1012 = vmatprep.subr.bf16.mxu1 %v2277_v27 }
 0x15b   :  { %970 = vmatpush1.bf16.msra.mxu0 %v2280_v28  ;;  %1013 = vmatpush1.bf16.msra.mxu1 %v2286_v30 }
 0x15c   :  { %971 = vmatprep.subr.bf16.mxu0 %v2283_v29  ;;  %1014 = vmatprep.subr.bf16.mxu1 %v2290_v31 }
 0x15f   :  { %972 = vmatpush1.bf16.msra.mxu0 %v2294_v32  ;;  %1015 = vmatpush1.bf16.msra.mxu1 %v2305_v35 }
 0x160   :  { %973 = vmatprep.subr.bf16.mxu0 %v2301_v34  ;;  %1016 = vmatprep.subr.bf16.mxu1 %v2308_v36 }
 0x163   :  { %974 = vmatpush1.bf16.msra.mxu0 %v2311_v37  ;;  %1017 = vmatpush1.bf16.msra.mxu1 %v2317_v39 }
 0x164   :  { %975 = vmatprep.subr.bf16.mxu0 %v2314_v38  ;;  %1018 = vmatprep.subr.bf16.mxu1 %v2321_v40 }
 0x167   :  { %976 = vmatpush1.bf16.msra.mxu0 %v2325_v41  ;;  %1019 = vmatpush1.bf16.msra.mxu1 %v2333_v43 }
 0x168   :  { %977 = vmatprep.subr.bf16.mxu0 %v2329_v42  ;;  %1020 = vmatprep.subr.bf16.mxu1 %v2339_v45 }
 0x16b   :  { %978 = vmatpush1.bf16.msra.mxu0 %v2342_v46  ;;  %1021 = vmatpush1.bf16.msra.mxu1 %v2348_v48 }
 0x16c   :  { %979 = vmatprep.subr.bf16.mxu0 %v2345_v47  ;;  %1022 = vmatprep.subr.bf16.mxu1 %v2352_v49 }
 0x16f   :  { %980 = vmatpush1.bf16.msra.mxu0 %v2356_v50  ;;  %1023 = vmatpush1.bf16.msra.mxu1 %v2362_v51 }
 0x170   :  { %1107 = vmatprep.subr.bf16.mxu0 %v2243_v14  ;;  %1150 = vmatprep.subr.bf16.mxu1 %v2250_v19 }
 0x212   :  { %v857_v59 = vpop.f32.mrf.mxu0  ;;  %v900_v2 = vpop.f32.mrf.mxu1 }
 0x213   :  { %v909_v6 = vadd.f32 %v857_v59, %v2466_v25  ;;  %v911_v55 = vadd.f32 %v900_v2, %v2475_v54 }
 0x214   :  { %v859_v3 = vpop.f32.mrf.mxu0  ;;  %v902_v10 = vpop.f32.mrf.mxu1 }
 0x215   :  { %v917_v7 = vmul.f32 0.5, %v909_v6  ;;  %v910_v12 = vadd.f32 %v859_v3, %v2472_v53  ;;  %v912_v54 = vadd.f32 %v902_v10, %v2481_v58 }
 0x216   :  { %v861_v8 = vpop.f32.mrf.mxu0  ;;  %v904_v13 = vpop.f32.mrf.mxu1 }
 0x217   :  { %1994 = vtanh.f32 %v917_v7  ;;  %v925_v9 = vmul.f32 0.5, %v910_v12  ;;  %v913_v63 = vadd.f32 %v861_v8, %v2478_v57  ;;  %v915_v25 = vadd.f32 %v904_v13, %v2487_v1 }
 0x218   :  { %v863_v14 = vpop.f32.mrf.mxu0  ;;  %v906_v53 = vpop.f32.mrf.mxu1  ;;  %v935_v15 = vmul.f32 0.5, %v912_v54 }
 0x219   :  { %1996 = vtanh.f32 %v925_v9  ;;  %v918_v19 = vmul.f32 0.5, %v913_v63  ;;  %v914_v11 = vadd.f32 %v863_v14, %v2484_v62  ;;  %v916_v16 = vadd.f32 %v906_v53, %v3087_v17 }
 0x21a   :  { %1998 = vtanh.f32 %v911_v55 }
 0x21b   :  { %2000 = vtanh.f32 %v918_v19  ;;  %v926_v5 = vmul.f32 0.5, %v914_v11  ;;  %v936_v62 = vmul.f32 0.5, %v916_v16 }
 0x21d   :  { %2002 = vtanh.f32 %v926_v5 }
 0x21e   :  { %2004 = vtanh.f32 %v915_v25 }
 0x21f   :  { %2006 = vtanh.f32 %v935_v15 }
 0x220   :  { %2008 = vtanh.f32 %v936_v62  ;;  %v3095_v62 = vld [vmem:[#allocation18_spill] sm:$0xff] }
 0x224   :  { %v1995_v44 = vpop.eup %1994 }
 0x225   :  { %v921_v57 = vmul.f32 0.5, %v1995_v44 }
 0x226   :  { %v1997_v0 = vpop.eup %1996 }
 0x227   :  { %v1999_v60 = vpop.eup %1998  ;;  %v923_v56 = vadd.f32 0.5, %v921_v57  ;;  %v929_v59 = vmul.f32 0.5, %v1997_v0 }
 0x228   :  { %v2001_v2 = vpop.eup %2000 }
 0x229   :  { %v931_v6 = vadd.f32 0.5, %v929_v59  ;;  %v945_v3 = vmul.f32 %v1999_v60, %v923_v56  ;;  %v922_v1 = vmul.f32 0.5, %v2001_v2  ;;  %v3094_v56 = vld [vmem:[#allocation14_spill] sm:$0xff] }
 0x22a   :  { %v2003_v7 = vpop.eup %2002 }
 0x22b   :  { %v943_v12 = vmul.f32 %v931_v6, %v2646_v33  ;;  %v924_v55 = vadd.f32 0.5, %v922_v1  ;;  %v930_v58 = vmul.f32 0.5, %v2003_v7  ;;  %v2005_v10 = vpop.eup %2004 }
 0x22c   :  { %v2007_v19 = vpop.eup %2006 }
 0x22d   :  { %v2695_v8 = vadd.f32 %v945_v3, %v943_v12  ;;  %v932_v9 = vadd.f32 0.5, %v930_v58  ;;  %v946_v63 = vmul.f32 %v2005_v10, %v924_v55  ;;  %v2009_v11 = vpop.eup %2008  ;;  %v939_v25 = vmul.f32 0.5, %v2007_v19 }
 0x22e   :  { %v940_v33 = vmul.f32 0.5, %v2009_v11 }
 0x22f   :  { %v944_v13 = vmul.f32 %v932_v9, %v2649_v61  ;;  %2010 = vtanh.f32 %v2695_v8  ;;  %v941_v53 = vadd.f32 0.5, %v939_v25  ;;  %v3093_v61 = vld [vmem:[#allocation16_spill] sm:$0xff] }
 0x230   :  { %v942_v54 = vadd.f32 0.5, %v940_v33 }
 0x231   :  { %v2699_v14 = vadd.f32 %v946_v63, %v944_v13 }
 0x233   :  { %2012 = vtanh.f32 %v2699_v14 }
 0x23c   :  { %v2011_v5 = vpop.eup %2010 }
 0x23d   :  { %v951_v16 = vmul.f32 %v2011_v5, %v941_v53 }
 0x240   :  { %v2013_v17 = vpop.eup %2012 }
 0x241   :  { %v952_v44 = vmul.f32 %v2013_v17, %v942_v54 }
 0x243   :  { %v964_v57 = vpack.c.bf16 %v952_v44, %v951_v16 }
 0x245   :  { %998 = vmatmul.mubr.bf16.vlgmr.msra.gmra.mxu0 %v964_v57  ;;  %1041 = vmatmul.mubr.bf16.vlgmr.msra.gmra.mxu1 %v964_v57 }
 0x246   :  { %1108 = vmatpush1.bf16.msra.mxu0 %v2248_v18  ;;  %1151 = vmatpush1.bf16.msra.mxu1 %v2255_v21  ;;  %v2734_v18 = vld [vmem:[#allocation6 + $0xe4] ss:$16 sps:$4 sm:$0xff]  }
 0x247   :  { %1109 = vmatprep.subr.bf16.mxu0 %v2253_v20  ;;  %1152 = vmatprep.subr.bf16.mxu1 %v2259_v22  ;;  %v2737_v20 = vld [vmem:[#allocation6 + $0xec] ss:$16 sps:$4 sm:$0xff]  }
 0x248   :  { %1139 = vmatprep.mubr.bf16.mxu0 %v3086_v52  ;;  %1182 = vmatprep.mubr.bf16.mxu1 %v3086_v52 }
 0x24a   :  { %1110 = vmatpush1.bf16.msra.mxu0 %v2263_v23  ;;  %1153 = vmatpush1.bf16.msra.mxu1 %v2274_v26  ;;  %v3088_v23 = vld [vmem:[#allocation9_spill] sm:$0xff] }
 0x24b   :  { %1111 = vmatprep.subr.bf16.mxu0 %v2267_v24  ;;  %1154 = vmatprep.subr.bf16.mxu1 %v2277_v27 }
 0x24e   :  { %1112 = vmatpush1.bf16.msra.mxu0 %v2280_v28  ;;  %1155 = vmatpush1.bf16.msra.mxu1 %v2286_v30 }
 0x24f   :  { %1113 = vmatprep.subr.bf16.mxu0 %v2283_v29  ;;  %1156 = vmatprep.subr.bf16.mxu1 %v2290_v31  ;;  %v3089_v29 = vld [vmem:[#allocation11_spill] sm:$0xff]  ;;  %v3090_v31 = vld [vmem:[#allocation12_spill] sm:$0xff] }
 0x252   :  { %1114 = vmatpush1.bf16.msra.mxu0 %v2294_v32  ;;  %1157 = vmatpush1.bf16.msra.mxu1 %v2305_v35 }
 0x253   :  { %1115 = vmatprep.subr.bf16.mxu0 %v2301_v34  ;;  %1158 = vmatprep.subr.bf16.mxu1 %v2308_v36  ;;  %v3091_v36 = vld [vmem:[#allocation13_spill] sm:$0xff] }
 0x256   :  { %1116 = vmatpush1.bf16.msra.mxu0 %v2311_v37  ;;  %1159 = vmatpush1.bf16.msra.mxu1 %v2317_v39 }
 0x257   :  { %1117 = vmatprep.subr.bf16.mxu0 %v2314_v38  ;;  %1160 = vmatprep.subr.bf16.mxu1 %v2321_v40 }
 0x25a   :  { %1118 = vmatpush1.bf16.msra.mxu0 %v2325_v41  ;;  %1161 = vmatpush1.bf16.msra.mxu1 %v2333_v43  ;;  %v3092_v41 = vld [vmem:[#allocation15_spill] sm:$0xff] }
 0x25b   :  { %1119 = vmatprep.subr.bf16.mxu0 %v2329_v42  ;;  %1162 = vmatprep.subr.bf16.mxu1 %v2339_v45 }
 0x25e   :  { %1120 = vmatpush1.bf16.msra.mxu0 %v2342_v46  ;;  %1163 = vmatpush1.bf16.msra.mxu1 %v2348_v48 }
 0x25f   :  { %1121 = vmatprep.subr.bf16.mxu0 %v2345_v47  ;;  %1164 = vmatprep.subr.bf16.mxu1 %v2352_v49 }
 0x262   :  { %1122 = vmatpush1.bf16.msra.mxu0 %v2356_v50  ;;  %1165 = vmatpush1.bf16.msra.mxu1 %v2362_v51 }
 0x263   :  { %1249 = vmatprep.subr.bf16.mxu0 %v2734_v18  ;;  %1292 = vmatprep.subr.bf16.mxu1 %v2737_v20 }
 0x305   :  { %v999_v21 = vpop.f32.mrf.mxu0  ;;  %v1042_v22 = vpop.f32.mrf.mxu1 }
 0x306   :  { %v1051_v24 = vadd.f32 %v999_v21, %v3088_v23  ;;  %v1053_v32 = vadd.f32 %v1042_v22, %v3090_v31 }
 0x307   :  { %v1001_v26 = vpop.f32.mrf.mxu0  ;;  %v1044_v27 = vpop.f32.mrf.mxu1 }
 0x308   :  { %v1059_v28 = vmul.f32 0.5, %v1051_v24  ;;  %v1052_v30 = vadd.f32 %v1001_v26, %v3089_v29  ;;  %v1054_v59 = vadd.f32 %v1044_v27, %v3094_v56  ;;  %v2803_v56 = vld [vmem:[#allocation6 + $0x6c] ss:$16 sps:$4 sm:$0xff]  }
 0x309   :  { %v1003_v34 = vpop.f32.mrf.mxu0  ;;  %v1046_v38 = vpop.f32.mrf.mxu1 }
 0x30a   :  { %2014 = vtanh.f32 %v1059_v28  ;;  %v1067_v35 = vmul.f32 0.5, %v1052_v30  ;;  %v1055_v37 = vadd.f32 %v1003_v34, %v3091_v36  ;;  %v1057_v0 = vadd.f32 %v1046_v38, %v3093_v61  ;;  %v2762_v34 = vld [vmem:[#allocation6 + $0xc4] ss:$16 sps:$4 sm:$0xff]   ;;  %v2770_v36 = vld [vmem:[#allocation6 + $0xc0] ss:$16 sps:$4 sm:$0xff]  }
 0x30b   :  { %v1005_v39 = vpop.f32.mrf.mxu0  ;;  %v1048_v60 = vpop.f32.mrf.mxu1  ;;  %v1077_v7 = vmul.f32 0.5, %v1054_v59  ;;  %v2776_v38 = vld [vmem:[#allocation6 + $0xa4] ss:$16 sps:$4 sm:$0xff]   ;;  %v2791_v61 = vld [vmem:[#allocation6 + $0x8c] ss:$16 sps:$4 sm:$0xff]  }
 0x30c   :  { %2016 = vtanh.f32 %v1067_v35  ;;  %v1060_v40 = vmul.f32 0.5, %v1055_v37  ;;  %v1056_v42 = vadd.f32 %v1005_v39, %v3092_v41  ;;  %v1058_v2 = vadd.f32 %v1048_v60, %v3095_v62  ;;  %v2765_v35 = vld [vmem:[#allocation6 + $0xcc] ss:$16 sps:$4 sm:$0xff]   ;;  %v2773_v37 = vld [vmem:[#allocation6 + $0xc8] ss:$16 sps:$4 sm:$0xff]  }
 0x30d   :  { %2018 = vtanh.f32 %v1053_v32  ;;  %v2759_v32 = vld [vmem:[#allocation6 + $0xe8] ss:$16 sps:$4 sm:$0xff]   ;;  %v2779_v39 = vld [vmem:[#allocation6 + $0xac] ss:$16 sps:$4 sm:$0xff]   ;;  %v2800_v60 = vld [vmem:[#allocation6 + $0x64] ss:$16 sps:$4 sm:$0xff]  }
 0x30e   :  { %2020 = vtanh.f32 %v1060_v40  ;;  %v1068_v15 = vmul.f32 0.5, %v1056_v42  ;;  %v1078_v10 = vmul.f32 0.5, %v1058_v2  ;;  %v2782_v40 = vld [vmem:[#allocation6 + $0xa0] ss:$16 sps:$4 sm:$0xff]   ;;  %v2785_v41 = vld [vmem:[#allocation6 + $0xa8] ss:$16 sps:$4 sm:$0xff]  }
 0x30f   :  { %v2788_v42 = vld [vmem:[#allocation6 + $0x84] ss:$16 sps:$4 sm:$0xff]   ;;  %v2806_v59 = vld [vmem:[#allocation6 + $0x60] ss:$16 sps:$4 sm:$0xff]   ;;  %v2809_v62 = vld [vmem:[#allocation6 + $0x68] ss:$16 sps:$4 sm:$0xff]  }
 0x310   :  { %2022 = vtanh.f32 %v1068_v15  ;;  %v2797_v15 = vld [vmem:[#allocation6 + $0x88] ss:$16 sps:$4 sm:$0xff]   ;;  %v2812_v2 = vld [vmem:[#allocation6 + $0x44] ss:$16 sps:$4 sm:$0xff]  }
 0x311   :  { %2024 = vtanh.f32 %v1057_v0  ;;  %v2794_v0 = vld [vmem:[#allocation6 + $0x80] ss:$16 sps:$4 sm:$0xff]  }
 0x312   :  { %2026 = vtanh.f32 %v1077_v7 }
 0x313   :  { %2028 = vtanh.f32 %v1078_v10 }
 0x317   :  { %v2015_v6 = vpop.eup %2014 }
 0x318   :  { %v1063_v3 = vmul.f32 0.5, %v2015_v6  ;;  %v2815_v6 = vld [vmem:[#allocation6 + $0x4c] ss:$16 sps:$4 sm:$0xff]  }
 0x319   :  { %v2017_v1 = vpop.eup %2016 }
 0x31a   :  { %v2019_v12 = vpop.eup %2018  ;;  %v1065_v55 = vadd.f32 0.5, %v1063_v3  ;;  %v1071_v58 = vmul.f32 0.5, %v2017_v1  ;;  %v2818_v3 = vld [vmem:[#allocation6 + $0x40] ss:$16 sps:$4 sm:$0xff]   ;;  %v2822_v1 = vld [vmem:[#allocation6 + $0x24] ss:$16 sps:$4 sm:$0xff]  }
 0x31b   :  { %v2021_v9 = vpop.eup %2020 }
 0x31c   :  { %v1073_v63 = vadd.f32 0.5, %v1071_v58  ;;  %v1087_v13 = vmul.f32 %v2019_v12, %v1065_v55  ;;  %v1064_v19 = vmul.f32 0.5, %v2021_v9  ;;  %v3096_v12 = vld [vmem:[#allocation17_spill] sm:$0xff] }
 0x31d   :  { %v2023_v11 = vpop.eup %2022 }
 0x31e   :  { %v1085_v25 = vmul.f32 %v1073_v63, %v2695_v8  ;;  %v1066_v33 = vadd.f32 0.5, %v1064_v19  ;;  %v1072_v5 = vmul.f32 0.5, %v2023_v11  ;;  %v2025_v53 = vpop.eup %2024  ;;  %v3099_v63 = vld [vmem:[#allocation21_spill] sm:$0xff] }
 0x31f   :  { %v2027_v21 = vpop.eup %2026 }
 0x320   :  { %v2749_v54 = vadd.f32 %v1087_v13, %v1085_v25  ;;  %v1074_v17 = vadd.f32 0.5, %v1072_v5  ;;  %v1088_v16 = vmul.f32 %v2025_v53, %v1066_v33  ;;  %v2029_v22 = vpop.eup %2028  ;;  %v1081_v23 = vmul.f32 0.5, %v2027_v21  ;;  %v3100_v25 = vld [vmem:[#allocation23_spill] sm:$0xff]  ;;  %v3101_v5 = vld [vmem:[#allocation24_spill] sm:$0xff] }
 0x321   :  { %v1082_v8 = vmul.f32 0.5, %v2029_v22  ;;  %v3103_v22 = vld [vmem:[#allocation26_spill] sm:$0xff] }
 0x322   :  { %v1086_v44 = vmul.f32 %v1074_v17, %v2699_v14  ;;  %2030 = vtanh.f32 %v2749_v54  ;;  %v1083_v26 = vadd.f32 0.5, %v1081_v23  ;;  %v2756_v14 = vld [vmem:[#allocation6 + $0xe0] ss:$16 sps:$4 sm:$0xff]  }
 0x323   :  { %v1084_v27 = vadd.f32 0.5, %v1082_v8 }
 0x324   :  { %v2753_v57 = vadd.f32 %v1088_v16, %v1086_v44  ;;  %v3102_v44 = vld [vmem:[#allocation22_spill] sm:$0xff] }
 0x326   :  { %2032 = vtanh.f32 %v2753_v57 }
 0x32f   :  { %v2031_v24 = vpop.eup %2030 }
 0x330   :  { %v1093_v29 = vmul.f32 %v2031_v24, %v1083_v26 }
 0x333   :  { %v2033_v28 = vpop.eup %2032 }
 0x334   :  { %v1094_v30 = vmul.f32 %v2033_v28, %v1084_v27 }
 0x336   :  { %v1106_v31 = vpack.c.bf16 %v1094_v30, %v1093_v29 }
 0x338   :  { %1140 = vmatmul.mubr.bf16.vlgmr.msra.gmra.mxu0 %v1106_v31  ;;  %1183 = vmatmul.mubr.bf16.vlgmr.msra.gmra.mxu1 %v1106_v31 }
 0x339   :  { %1250 = vmatpush1.bf16.msra.mxu0 %v2756_v14  ;;  %1293 = vmatpush1.bf16.msra.mxu1 %v2759_v32 }
 0x33a   :  { %1251 = vmatprep.subr.bf16.mxu0 %v2762_v34  ;;  %1294 = vmatprep.subr.bf16.mxu1 %v2765_v35 }
 0x33b   :  { %1281 = vmatprep.mubr.bf16.mxu0 %v3086_v52  ;;  %1324 = vmatprep.mubr.bf16.mxu1 %v3086_v52 }
 0x33d   :  { %1252 = vmatpush1.bf16.msra.mxu0 %v2770_v36  ;;  %1295 = vmatpush1.bf16.msra.mxu1 %v2773_v37 }
 0x33e   :  { %1253 = vmatprep.subr.bf16.mxu0 %v2776_v38  ;;  %1296 = vmatprep.subr.bf16.mxu1 %v2779_v39 }
 0x341   :  { %1254 = vmatpush1.bf16.msra.mxu0 %v2782_v40  ;;  %1297 = vmatpush1.bf16.msra.mxu1 %v2785_v41 }
 0x342   :  { %1255 = vmatprep.subr.bf16.mxu0 %v2788_v42  ;;  %1298 = vmatprep.subr.bf16.mxu1 %v2791_v61 }
 0x345   :  { %1256 = vmatpush1.bf16.msra.mxu0 %v2794_v0  ;;  %1299 = vmatpush1.bf16.msra.mxu1 %v2797_v15 }
 0x346   :  { %1257 = vmatprep.subr.bf16.mxu0 %v2800_v60  ;;  %1300 = vmatprep.subr.bf16.mxu1 %v2803_v56 }
 0x349   :  { %1258 = vmatpush1.bf16.msra.mxu0 %v2806_v59  ;;  %1301 = vmatpush1.bf16.msra.mxu1 %v2809_v62 }
 0x34a   :  { %1259 = vmatprep.subr.bf16.mxu0 %v2812_v2  ;;  %1302 = vmatprep.subr.bf16.mxu1 %v2815_v6 }
 0x34d   :  { %1260 = vmatpush1.bf16.msra.mxu0 %v2818_v3  ;;  %1303 = vmatpush1.bf16.msra.mxu1 %v2333_v43 }
 0x34e   :  { %1261 = vmatprep.subr.bf16.mxu0 %v2822_v1  ;;  %1304 = vmatprep.subr.bf16.mxu1 %v2339_v45 }
 0x351   :  { %1262 = vmatpush1.bf16.msra.mxu0 %v2342_v46  ;;  %1305 = vmatpush1.bf16.msra.mxu1 %v2348_v48  ;;  %v3097_v48 = vld [vmem:[#allocation19_spill] sm:$0xff] }
 0x352   :  { %1263 = vmatprep.subr.bf16.mxu0 %v2345_v47  ;;  %1306 = vmatprep.subr.bf16.mxu1 %v2352_v49  ;;  %v3098_v47 = vld [vmem:[#allocation20_spill] sm:$0xff] }
 0x355   :  { %1264 = vmatpush1.bf16.msra.mxu0 %v2356_v50  ;;  %1307 = vmatpush1.bf16.msra.mxu1 %v2362_v51 }
 0x356   :  { %1391 = vmatprep.subr.bf16.mxu0 %v2734_v18  ;;  %1434 = vmatprep.subr.bf16.mxu1 %v2737_v20 }
 0x3f8   :  { %v1141_v43 = vpop.f32.mrf.mxu0  ;;  %v1184_v7 = vpop.f32.mrf.mxu1 }
 0x3f9   :  { %v1193_v45 = vadd.f32 %v1141_v43, %v3096_v12  ;;  %v1195_v9 = vadd.f32 %v1184_v7, %v3098_v47 }
 0x3fa   :  { %v1143_v55 = vpop.f32.mrf.mxu0  ;;  %v1186_v46 = vpop.f32.mrf.mxu1 }
 0x3fb   :  { %v1201_v58 = vmul.f32 0.5, %v1193_v45  ;;  %v1194_v10 = vadd.f32 %v1143_v55, %v3097_v48  ;;  %v1196_v21 = vadd.f32 %v1186_v46, %v3102_v44  ;;  %v2877_v44 = vld [vmem:[#allocation6 + $0x2c] ss:$16 sps:$4 sm:$0xff]  }
 0x3fc   :  { %v1145_v49 = vpop.f32.mrf.mxu0  ;;  %v1188_v13 = vpop.f32.mrf.mxu1 }
 0x3fd   :  { %2034 = vtanh.f32 %v1201_v58  ;;  %v1209_v50 = vmul.f32 0.5, %v1194_v10  ;;  %v1197_v51 = vadd.f32 %v1145_v49, %v3099_v63  ;;  %v1199_v53 = vadd.f32 %v1188_v13, %v3101_v5 }
 0x3fe   :  { %v1147_v19 = vpop.f32.mrf.mxu0  ;;  %v1190_v16 = vpop.f32.mrf.mxu1  ;;  %v1219_v27 = vmul.f32 0.5, %v1196_v21  ;;  %v2880_v21 = vld [vmem:[#allocation6 + $0x20] ss:$16 sps:$4 sm:$0xff]  }
 0x3ff   :  { %2036 = vtanh.f32 %v1209_v50  ;;  %v1202_v11 = vmul.f32 0.5, %v1197_v51  ;;  %v1198_v33 = vadd.f32 %v1147_v19, %v3100_v25  ;;  %v1200_v23 = vadd.f32 %v1190_v16, %v3103_v22  ;;  %v2883_v22 = vld [vmem:[#allocation6 + $0x28] ss:$16 sps:$4 sm:$0xff]  }
 0x400   :  { %2038 = vtanh.f32 %v1195_v9 }
 0x401   :  { %2040 = vtanh.f32 %v1202_v11  ;;  %v1210_v17 = vmul.f32 0.5, %v1198_v33  ;;  %v1220_v31 = vmul.f32 0.5, %v1200_v23  ;;  %v2886_v23 = vld [vmem:[#allocation6 + $0x4] ss:$16 sps:$4 sm:$0xff]  }
 0x403   :  { %2042 = vtanh.f32 %v1210_v17 }
 0x404   :  { %2044 = vtanh.f32 %v1199_v53 }
 0x405   :  { %2046 = vtanh.f32 %v1219_v27 }
 0x406   :  { %2048 = vtanh.f32 %v1220_v31 }
 0x40a   :  { %v2035_v8 = vpop.eup %2034 }
 0x40b   :  { %v1205_v24 = vmul.f32 0.5, %v2035_v8  ;;  %v2889_v8 = vld [vmem:[#allocation6 + $0xc] ss:$16 sps:$4 sm:$0xff]  }
 0x40c   :  { %v2037_v26 = vpop.eup %2036 }
 0x40d   :  { %v2039_v28 = vpop.eup %2038  ;;  %v1207_v29 = vadd.f32 0.5, %v1205_v24  ;;  %v1213_v30 = vmul.f32 0.5, %v2037_v26  ;;  %v2892_v24 = vld [vmem:[#allocation6] ss:$16 sps:$4 sm:$0xff]   ;;  %v2895_v26 = vld [vmem:[#allocation6 + $0x8] ss:$16 sps:$4 sm:$0xff]  }
 0x40e   :  { %v2041_v43 = vpop.eup %2040 }
 0x40f   :  { %v1215_v7 = vadd.f32 0.5, %v1213_v30  ;;  %v1229_v12 = vmul.f32 %v2039_v28, %v1207_v29  ;;  %v1206_v45 = vmul.f32 0.5, %v2041_v43  ;;  %v3104_v29 = vld [vmem:[#allocation25_spill] sm:$0xff] }
 0x410   :  { %v2043_v55 = vpop.eup %2042 }
 0x411   :  { %v1227_v58 = vmul.f32 %v1215_v7, %v2749_v54  ;;  %v1208_v48 = vadd.f32 0.5, %v1206_v45  ;;  %v1214_v46 = vmul.f32 0.5, %v2043_v55  ;;  %v2045_v10 = vpop.eup %2044  ;;  %v3106_v55 = vld [vmem:[#allocation28_spill] sm:$0xff] }
 0x412   :  { %v2047_v51 = vpop.eup %2046 }
 0x413   :  { %v2843_v47 = vadd.f32 %v1229_v12, %v1227_v58  ;;  %v1216_v9 = vadd.f32 0.5, %v1214_v46  ;;  %v1230_v49 = vmul.f32 %v2045_v10, %v1208_v48  ;;  %v2049_v13 = vpop.eup %2048  ;;  %v1223_v19 = vmul.f32 0.5, %v2047_v51  ;;  %v3105_v12 = vld [vmem:[#allocation27_spill] sm:$0xff]  ;;  %v3107_v10 = vld [vmem:[#allocation29_spill] sm:$0xff] }
 0x414   :  { %v1224_v54 = vmul.f32 0.5, %v2049_v13  ;;  %v3108_v13 = vld [vmem:[#allocation31_spill] sm:$0xff] }
 0x415   :  { %v1228_v50 = vmul.f32 %v1216_v9, %v2753_v57  ;;  %2050 = vtanh.f32 %v2843_v47  ;;  %v1225_v25 = vadd.f32 0.5, %v1223_v19  ;;  %v2873_v57 = vld [vmem:[#allocation6 + $0x48] ss:$16 sps:$4 sm:$0xff]  }
 0x416   :  { %v1226_v33 = vadd.f32 0.5, %v1224_v54  ;;  %v3109_v54 = vld [vmem:[#allocation32_spill] sm:$0xff] }
 0x417   :  { %v2847_v63 = vadd.f32 %v1230_v49, %v1228_v50 }
 0x419   :  { %2052 = vtanh.f32 %v2847_v63 }
 0x422   :  { %v2051_v11 = vpop.eup %2050 }
 0x423   :  { %v1235_v53 = vmul.f32 %v2051_v11, %v1225_v25 }
 0x426   :  { %v2053_v5 = vpop.eup %2052 }
 0x427   :  { %v1236_v17 = vmul.f32 %v2053_v5, %v1226_v33  ;;  %v3110_v5 = vld [vmem:[#allocation30_spill] sm:$0xff] }
 0x429   :  { %v1248_v16 = vpack.c.bf16 %v1236_v17, %v1235_v53  ;;  %v3111_v17 = vld [vmem:[#allocation34_spill] sm:$0xff] }
 0x42b   :  { %1282 = vmatmul.mubr.bf16.vlgmr.msra.gmra.mxu0 %v1248_v16  ;;  %1325 = vmatmul.mubr.bf16.vlgmr.msra.gmra.mxu1 %v1248_v16 }
 0x42c   :  { %1392 = vmatpush1.bf16.msra.mxu0 %v2756_v14  ;;  %1435 = vmatpush1.bf16.msra.mxu1 %v2759_v32 }
 0x42d   :  { %1393 = vmatprep.subr.bf16.mxu0 %v2762_v34  ;;  %1436 = vmatprep.subr.bf16.mxu1 %v2765_v35 }
 0x42e   :  { %1423 = vmatprep.mubr.bf16.mxu0 %v3086_v52  ;;  %1466 = vmatprep.mubr.bf16.mxu1 %v3086_v52 }
 0x430   :  { %1394 = vmatpush1.bf16.msra.mxu0 %v2770_v36  ;;  %1437 = vmatpush1.bf16.msra.mxu1 %v2773_v37 }
 0x431   :  { %1395 = vmatprep.subr.bf16.mxu0 %v2776_v38  ;;  %1438 = vmatprep.subr.bf16.mxu1 %v2779_v39 }
 0x434   :  { %1396 = vmatpush1.bf16.msra.mxu0 %v2782_v40  ;;  %1439 = vmatpush1.bf16.msra.mxu1 %v2785_v41 }
 0x435   :  { %1397 = vmatprep.subr.bf16.mxu0 %v2788_v42  ;;  %1440 = vmatprep.subr.bf16.mxu1 %v2791_v61 }
 0x438   :  { %1398 = vmatpush1.bf16.msra.mxu0 %v2794_v0  ;;  %1441 = vmatpush1.bf16.msra.mxu1 %v2797_v15 }
 0x439   :  { %1399 = vmatprep.subr.bf16.mxu0 %v2800_v60  ;;  %1442 = vmatprep.subr.bf16.mxu1 %v2803_v56 }
 0x43c   :  { %1400 = vmatpush1.bf16.msra.mxu0 %v2806_v59  ;;  %1443 = vmatpush1.bf16.msra.mxu1 %v2809_v62 }
 0x43d   :  { %1401 = vmatprep.subr.bf16.mxu0 %v2812_v2  ;;  %1444 = vmatprep.subr.bf16.mxu1 %v2815_v6 }
 0x440   :  { %1402 = vmatpush1.bf16.msra.mxu0 %v2818_v3  ;;  %1445 = vmatpush1.bf16.msra.mxu1 %v2873_v57 }
 0x441   :  { %1403 = vmatprep.subr.bf16.mxu0 %v2822_v1  ;;  %1446 = vmatprep.subr.bf16.mxu1 %v2877_v44 }
 0x444   :  { %1404 = vmatpush1.bf16.msra.mxu0 %v2880_v21  ;;  %1447 = vmatpush1.bf16.msra.mxu1 %v2883_v22 }
 0x445   :  { %1405 = vmatprep.subr.bf16.mxu0 %v2886_v23  ;;  %1448 = vmatprep.subr.bf16.mxu1 %v2889_v8 }
 0x448   :  { %1406 = vmatpush1.bf16.msra.mxu0 %v2892_v24  ;;  %1449 = vmatpush1.bf16.msra.mxu1 %v2895_v26 }
 0x449   :  { %1533 = vmatprep.subr.bf16.mxu0 %v2734_v18  ;;  %1576 = vmatprep.subr.bf16.mxu1 %v2737_v20 }
 0x4eb   :  { %v1283_v27 = vpop.f32.mrf.mxu0  ;;  %v1326_v28 = vpop.f32.mrf.mxu1 }
 0x4ec   :  { %v1335_v30 = vadd.f32 %v1283_v27, %v3104_v29  ;;  %v1337_v58 = vadd.f32 %v1326_v28, %v3106_v55 }
 0x4ed   :  { %v1285_v31 = vpop.f32.mrf.mxu0  ;;  %v1328_v43 = vpop.f32.mrf.mxu1 }
 0x4ee   :  { %v1343_v7 = vmul.f32 0.5, %v1335_v30  ;;  %v1336_v45 = vadd.f32 %v1285_v31, %v3105_v12  ;;  %v1338_v53 = vadd.f32 %v1328_v43, %v3110_v5 }
 0x4ef   :  { %v1287_v48 = vpop.f32.mrf.mxu0  ;;  %v1330_v49 = vpop.f32.mrf.mxu1 }
 0x4f0   :  { %2054 = vtanh.f32 %v1343_v7  ;;  %v1351_v46 = vmul.f32 0.5, %v1336_v45  ;;  %v1339_v9 = vadd.f32 %v1287_v48, %v3107_v10  ;;  %v1341_v11 = vadd.f32 %v1330_v49, %v3109_v54 }
 0x4f1   :  { %v1289_v50 = vpop.f32.mrf.mxu0  ;;  %v1332_v33 = vpop.f32.mrf.mxu1  ;;  %v1361_v30 = vmul.f32 0.5, %v1338_v53 }
 0x4f2   :  { %2056 = vtanh.f32 %v1351_v46  ;;  %v1344_v51 = vmul.f32 0.5, %v1339_v9  ;;  %v1340_v19 = vadd.f32 %v1289_v50, %v3108_v13  ;;  %v1342_v16 = vadd.f32 %v1332_v33, %v3111_v17 }
 0x4f3   :  { %2058 = vtanh.f32 %v1337_v58 }
 0x4f4   :  { %2060 = vtanh.f32 %v1344_v51  ;;  %v1352_v25 = vmul.f32 0.5, %v1340_v19  ;;  %v1362_v45 = vmul.f32 0.5, %v1342_v16 }
 0x4f6   :  { %2062 = vtanh.f32 %v1352_v25 }
 0x4f7   :  { %2064 = vtanh.f32 %v1341_v11 }
 0x4f8   :  { %2066 = vtanh.f32 %v1361_v30 }
 0x4f9   :  { %2068 = vtanh.f32 %v1362_v45 }
 0x4fd   :  { %v2055_v27 = vpop.eup %2054 }
 0x4fe   :  { %v1347_v28 = vmul.f32 0.5, %v2055_v27 }
 0x4ff   :  { %v2057_v29 = vpop.eup %2056 }
 0x500   :  { %v2059_v31 = vpop.eup %2058  ;;  %v1349_v7 = vadd.f32 0.5, %v1347_v28  ;;  %v1355_v12 = vmul.f32 0.5, %v2057_v29 }
 0x501   :  { %v2061_v55 = vpop.eup %2060 }
 0x502   :  { %v1357_v58 = vadd.f32 0.5, %v1355_v12  ;;  %v1371_v48 = vmul.f32 %v2059_v31, %v1349_v7  ;;  %v1348_v46 = vmul.f32 0.5, %v2061_v55  ;;  %v3112_v7 = vld [vmem:[#allocation33_spill] sm:$0xff] }
 0x503   :  { %v2063_v10 = vpop.eup %2062 }
 0x504   :  { %v1369_v9 = vmul.f32 %v1357_v58, %v2843_v47  ;;  %v1350_v49 = vadd.f32 0.5, %v1348_v46  ;;  %v1356_v43 = vmul.f32 0.5, %v2063_v10  ;;  %v2065_v50 = vpop.eup %2064  ;;  %v3114_v10 = vld [vmem:[#allocation36_spill] sm:$0xff] }
 0x505   :  { %v2067_v25 = vpop.eup %2066 }
 0x506   :  { %v2909_v51 = vadd.f32 %v1371_v48, %v1369_v9  ;;  %v1358_v13 = vadd.f32 0.5, %v1356_v43  ;;  %v1372_v19 = vmul.f32 %v2065_v50, %v1350_v49  ;;  %v2069_v33 = vpop.eup %2068  ;;  %v1365_v5 = vmul.f32 0.5, %v2067_v25  ;;  %v3113_v48 = vld [vmem:[#allocation35_spill] sm:$0xff]  ;;  %v3115_v50 = vld [vmem:[#allocation37_spill] sm:$0xff] }
 0x507   :  { %v1366_v47 = vmul.f32 0.5, %v2069_v33  ;;  %v3117_v33 = vld [vmem:[#allocation40_spill] sm:$0xff] }
 0x508   :  { %v1370_v54 = vmul.f32 %v1358_v13, %v2847_v63  ;;  %2070 = vtanh.f32 %v2909_v51  ;;  %v1367_v17 = vadd.f32 0.5, %v1365_v5 }
 0x509   :  { %v1368_v16 = vadd.f32 0.5, %v1366_v47 }
 0x50a   :  { %v2913_v11 = vadd.f32 %v1372_v19, %v1370_v54  ;;  %v3116_v54 = vld [vmem:[#allocation39_spill] sm:$0xff] }
 0x50c   :  { %2072 = vtanh.f32 %v2913_v11 }
 0x515   :  { %v2071_v53 = vpop.eup %2070 }
 0x516   :  { %v1377_v28 = vmul.f32 %v2071_v53, %v1367_v17  ;;  %v3118_v17 = vld [vmem:[#allocation38_spill] sm:$0xff] }
 0x519   :  { %v2073_v27 = vpop.eup %2072 }
 0x51a   :  { %v1378_v29 = vmul.f32 %v2073_v27, %v1368_v16  ;;  %v3119_v27 = vld [vmem:[#allocation42_spill] sm:$0xff] }
 0x51c   :  { %v1390_v30 = vpack.c.bf16 %v1378_v29, %v1377_v28 }
 0x51e   :  { %1424 = vmatmul.mubr.bf16.vlgmr.msra.gmra.mxu0 %v1390_v30  ;;  %1467 = vmatmul.mubr.bf16.vlgmr.msra.gmra.mxu1 %v1390_v30 }
 0x51f   :  { %1534 = vmatpush1.bf16.msra.mxu0 %v2756_v14  ;;  %1577 = vmatpush1.bf16.msra.mxu1 %v2759_v32 }
 0x520   :  { %1535 = vmatprep.subr.bf16.mxu0 %v2762_v34  ;;  %1578 = vmatprep.subr.bf16.mxu1 %v2765_v35 }
 0x521   :  { %1565 = vmatprep.mubr.bf16.mxu0 %v3086_v52  ;;  %1608 = vmatprep.mubr.bf16.mxu1 %v3086_v52 }
 0x523   :  { %1536 = vmatpush1.bf16.msra.mxu0 %v2770_v36  ;;  %1579 = vmatpush1.bf16.msra.mxu1 %v2773_v37 }
 0x524   :  { %1537 = vmatprep.subr.bf16.mxu0 %v2776_v38  ;;  %1580 = vmatprep.subr.bf16.mxu1 %v2779_v39 }
 0x527   :  { %1538 = vmatpush1.bf16.msra.mxu0 %v2782_v40  ;;  %1581 = vmatpush1.bf16.msra.mxu1 %v2785_v41 }
 0x528   :  { %1539 = vmatprep.subr.bf16.mxu0 %v2788_v42  ;;  %1582 = vmatprep.subr.bf16.mxu1 %v2791_v61 }
 0x52b   :  { %1540 = vmatpush1.bf16.msra.mxu0 %v2794_v0  ;;  %1583 = vmatpush1.bf16.msra.mxu1 %v2797_v15 }
 0x52c   :  { %1541 = vmatprep.subr.bf16.mxu0 %v2800_v60  ;;  %1584 = vmatprep.subr.bf16.mxu1 %v2803_v56 }
 0x52f   :  { %1542 = vmatpush1.bf16.msra.mxu0 %v2806_v59  ;;  %1585 = vmatpush1.bf16.msra.mxu1 %v2809_v62 }
 0x530   :  { %1543 = vmatprep.subr.bf16.mxu0 %v2812_v2  ;;  %1586 = vmatprep.subr.bf16.mxu1 %v2815_v6 }
 0x533   :  { %1544 = vmatpush1.bf16.msra.mxu0 %v2818_v3  ;;  %1587 = vmatpush1.bf16.msra.mxu1 %v2873_v57 }
 0x534   :  { %1545 = vmatprep.subr.bf16.mxu0 %v2822_v1  ;;  %1588 = vmatprep.subr.bf16.mxu1 %v2877_v44 }
 0x537   :  { %1546 = vmatpush1.bf16.msra.mxu0 %v2880_v21  ;;  %1589 = vmatpush1.bf16.msra.mxu1 %v2883_v22 }
 0x538   :  { %1547 = vmatprep.subr.bf16.mxu0 %v2886_v23  ;;  %1590 = vmatprep.subr.bf16.mxu1 %v2889_v8 }
 0x53b   :  { %1548 = vmatpush1.bf16.msra.mxu0 %v2892_v24  ;;  %1591 = vmatpush1.bf16.msra.mxu1 %v2895_v26 }
 0x53c   :  { %1675 = vmatprep.subr.bf16.mxu0 %v2734_v18  ;;  %1718 = vmatprep.subr.bf16.mxu1 %v2737_v20 }
 0x5de   :  { %v1425_v63 = vpop.f32.mrf.mxu0  ;;  %v1468_v31 = vpop.f32.mrf.mxu1 }
 0x5df   :  { %v1477_v12 = vadd.f32 %v1425_v63, %v3112_v7  ;;  %v1479_v9 = vadd.f32 %v1468_v31, %v3114_v10 }
 0x5e0   :  { %v1427_v45 = vpop.f32.mrf.mxu0  ;;  %v1470_v55 = vpop.f32.mrf.mxu1 }
 0x5e1   :  { %v1485_v58 = vmul.f32 0.5, %v1477_v12  ;;  %v1478_v46 = vadd.f32 %v1427_v45, %v3113_v48  ;;  %v1480_v16 = vadd.f32 %v1470_v55, %v3118_v17 }
 0x5e2   :  { %v1429_v49 = vpop.f32.mrf.mxu0  ;;  %v1472_v19 = vpop.f32.mrf.mxu1 }
 0x5e3   :  { %2074 = vtanh.f32 %v1485_v58  ;;  %v1493_v43 = vmul.f32 0.5, %v1478_v46  ;;  %v1481_v13 = vadd.f32 %v1429_v49, %v3115_v50  ;;  %v1483_v5 = vadd.f32 %v1472_v19, %v3117_v33 }
 0x5e4   :  { %v1431_v18 = vpop.f32.mrf.mxu0  ;;  %v1474_v53 = vpop.f32.mrf.mxu1  ;;  %v1503_v31 = vmul.f32 0.5, %v1480_v16 }
 0x5e5   :  { %2076 = vtanh.f32 %v1493_v43  ;;  %v1486_v20 = vmul.f32 0.5, %v1481_v13  ;;  %v1482_v25 = vadd.f32 %v1431_v18, %v3116_v54  ;;  %v1484_v28 = vadd.f32 %v1474_v53, %v3119_v27 }
 0x5e6   :  { %2078 = vtanh.f32 %v1479_v9 }
 0x5e7   :  { %2080 = vtanh.f32 %v1486_v20  ;;  %v1494_v47 = vmul.f32 0.5, %v1482_v25  ;;  %v1504_v58 = vmul.f32 0.5, %v1484_v28 }
 0x5e9   :  { %2082 = vtanh.f32 %v1494_v47 }
 0x5ea   :  { %2084 = vtanh.f32 %v1483_v5 }
 0x5eb   :  { %2086 = vtanh.f32 %v1503_v31 }
 0x5ec   :  { %2088 = vtanh.f32 %v1504_v58 }
 0x5f0   :  { %v2075_v29 = vpop.eup %2074 }
 0x5f1   :  { %v1489_v30 = vmul.f32 0.5, %v2075_v29 }
 0x5f2   :  { %v2077_v63 = vpop.eup %2076 }
 0x5f3   :  { %v2079_v7 = vpop.eup %2078  ;;  %v1491_v12 = vadd.f32 0.5, %v1489_v30  ;;  %v1497_v45 = vmul.f32 0.5, %v2077_v63 }
 0x5f4   :  { %v2081_v48 = vpop.eup %2080 }
 0x5f5   :  { %v1499_v46 = vadd.f32 0.5, %v1497_v45  ;;  %v1513_v10 = vmul.f32 %v2079_v7, %v1491_v12  ;;  %v1490_v9 = vmul.f32 0.5, %v2081_v48 }
 0x5f6   :  { %v2083_v49 = vpop.eup %2082 }
 0x5f7   :  { %v1511_v43 = vmul.f32 %v1499_v46, %v2909_v51  ;;  %v1492_v50 = vadd.f32 0.5, %v1490_v9  ;;  %v1498_v55 = vmul.f32 0.5, %v2083_v49  ;;  %v2085_v13 = vpop.eup %2084 }
 0x5f8   :  { %v2087_v33 = vpop.eup %2086 }
 0x5f9   :  { %v2959_v19 = vadd.f32 %v1513_v10, %v1511_v43  ;;  %v1500_v18 = vadd.f32 0.5, %v1498_v55  ;;  %v1514_v20 = vmul.f32 %v2085_v13, %v1492_v50  ;;  %v2089_v5 = vpop.eup %2088  ;;  %v1507_v47 = vmul.f32 0.5, %v2087_v33 }
 0x5fa   :  { %v1508_v51 = vmul.f32 0.5, %v2089_v5 }
 0x5fb   :  { %v1512_v54 = vmul.f32 %v1500_v18, %v2913_v11  ;;  %2090 = vtanh.f32 %v2959_v19  ;;  %v1509_v17 = vadd.f32 0.5, %v1507_v47 }
 0x5fc   :  { %v1510_v16 = vadd.f32 0.5, %v1508_v51 }
 0x5fd   :  { %v2963_v25 = vadd.f32 %v1514_v20, %v1512_v54 }
 0x5ff   :  { %2092 = vtanh.f32 %v2963_v25 }
 0x608   :  { %v2091_v53 = vpop.eup %2090 }
 0x609   :  { %v1519_v28 = vmul.f32 %v2091_v53, %v1509_v17 }
 0x60c   :  { %v2093_v27 = vpop.eup %2092 }
 0x60d   :  { %v1520_v29 = vmul.f32 %v2093_v27, %v1510_v16 }
 0x60f   :  { %v1532_v30 = vpack.c.bf16 %v1520_v29, %v1519_v28 }
 0x611   :  { %1566 = vmatmul.mubr.bf16.vlgmr.msra.gmra.mxu0 %v1532_v30  ;;  %1609 = vmatmul.mubr.bf16.vlgmr.msra.gmra.mxu1 %v1532_v30 }
 0x612   :  { %1676 = vmatpush1.bf16.msra.mxu0 %v2756_v14  ;;  %1719 = vmatpush1.bf16.msra.mxu1 %v2759_v32  ;;  %v3120_v32 = vld [vmem:[#allocation41_spill] sm:$0xff] }
 0x613   :  { %1677 = vmatprep.subr.bf16.mxu0 %v2762_v34  ;;  %1720 = vmatprep.subr.bf16.mxu1 %v2765_v35 }
 0x614   :  { %1707 = vmatprep.mubr.bf16.mxu0 %v3086_v52  ;;  %1750 = vmatprep.mubr.bf16.mxu1 %v3086_v52 }
 0x616   :  { %1678 = vmatpush1.bf16.msra.mxu0 %v2770_v36  ;;  %1721 = vmatpush1.bf16.msra.mxu1 %v2773_v37 }
 0x617   :  { %1679 = vmatprep.subr.bf16.mxu0 %v2776_v38  ;;  %1722 = vmatprep.subr.bf16.mxu1 %v2779_v39  ;;  %v3121_v38 = vld [vmem:[#allocation43_spill] sm:$0xff] }
 0x61a   :  { %1680 = vmatpush1.bf16.msra.mxu0 %v2782_v40  ;;  %1723 = vmatpush1.bf16.msra.mxu1 %v2785_v41  ;;  %v3122_v40 = vld [vmem:[#allocation44_spill] sm:$0xff] }
 0x61b   :  { %1681 = vmatprep.subr.bf16.mxu0 %v2788_v42  ;;  %1724 = vmatprep.subr.bf16.mxu1 %v2791_v61 }
 0x61e   :  { %1682 = vmatpush1.bf16.msra.mxu0 %v2794_v0  ;;  %1725 = vmatpush1.bf16.msra.mxu1 %v2797_v15  ;;  %v3123_v0 = vld [vmem:[#allocation45_spill] sm:$0xff] }
 0x61f   :  { %1683 = vmatprep.subr.bf16.mxu0 %v2800_v60  ;;  %1726 = vmatprep.subr.bf16.mxu1 %v2803_v56 }
 0x622   :  { %1684 = vmatpush1.bf16.msra.mxu0 %v2806_v59  ;;  %1727 = vmatpush1.bf16.msra.mxu1 %v2809_v62  ;;  %v3124_v62 = vld [vmem:[#allocation47_spill] sm:$0xff] }
 0x623   :  { %1685 = vmatprep.subr.bf16.mxu0 %v2812_v2  ;;  %1728 = vmatprep.subr.bf16.mxu1 %v2815_v6  ;;  %v3125_v6 = vld [vmem:[#allocation48_spill] sm:$0xff] }
 0x626   :  { %1686 = vmatpush1.bf16.msra.mxu0 %v2818_v3  ;;  %1729 = vmatpush1.bf16.msra.mxu1 %v2873_v57 }
 0x627   :  { %1687 = vmatprep.subr.bf16.mxu0 %v2822_v1  ;;  %1730 = vmatprep.subr.bf16.mxu1 %v2877_v44  ;;  %v3126_v44 = vld [vmem:[#allocation46_spill] sm:$0xff] }
 0x62a   :  { %1688 = vmatpush1.bf16.msra.mxu0 %v2880_v21  ;;  %1731 = vmatpush1.bf16.msra.mxu1 %v2883_v22  ;;  %v3127_v22 = vld [vmem:[#allocation50_spill] sm:$0xff] }
 0x62b   :  { %1689 = vmatprep.subr.bf16.mxu0 %v2886_v23  ;;  %1732 = vmatprep.subr.bf16.mxu1 %v2889_v8 }
 0x62e   :  { %1690 = vmatpush1.bf16.msra.mxu0 %v2892_v24  ;;  %1733 = vmatpush1.bf16.msra.mxu1 %v2895_v26 }
 0x6d1   :  { %v1567_v52 = vpop.f32.mrf.mxu0  ;;  %v1610_v14 = vpop.f32.mrf.mxu1 }
 0x6d2   :  { %v1619_v34 = vadd.f32 %v1567_v52, %v3120_v32  ;;  %v1621_v41 = vadd.f32 %v1610_v14, %v3122_v40  ;;  %v3128_v52 = vld [vmem:[#allocation49_spill] sm:$0xff] }
 0x6d3   :  { %v1569_v35 = vpop.f32.mrf.mxu0  ;;  %v1612_v36 = vpop.f32.mrf.mxu1 }
 0x6d4   :  { %v1627_v37 = vmul.f32 0.5, %v1619_v34  ;;  %v1620_v39 = vadd.f32 %v1569_v35, %v3121_v38  ;;  %v1622_v21 = vadd.f32 %v1612_v36, %v3126_v44  ;;  %v3129_v36 = vld [vmem:[#allocation51_spill] sm:$0xff]  ;;  %v3130_v38 = vld [vmem:[#allocation52_spill] sm:$0xff] }
 0x6d5   :  { %v1571_v42 = vpop.f32.mrf.mxu0  ;;  %v1614_v60 = vpop.f32.mrf.mxu1 }
 0x6d6   :  { %2094 = vtanh.f32 %v1627_v37  ;;  %v1635_v61 = vmul.f32 0.5, %v1620_v39  ;;  %v1623_v15 = vadd.f32 %v1571_v42, %v3123_v0  ;;  %v1625_v3 = vadd.f32 %v1614_v60, %v3125_v6  ;;  %v3131_v42 = vld [vmem:[#allocation53_spill] sm:$0xff] }
 0x6d7   :  { %v1573_v56 = vpop.f32.mrf.mxu0  ;;  %v1616_v57 = vpop.f32.mrf.mxu1  ;;  %v1645_v11 = vmul.f32 0.5, %v1622_v21 }
 0x6d8   :  { %2096 = vtanh.f32 %v1635_v61  ;;  %v1628_v59 = vmul.f32 0.5, %v1623_v15  ;;  %v1624_v2 = vadd.f32 %v1573_v56, %v3124_v62  ;;  %v1626_v23 = vadd.f32 %v1616_v57, %v3127_v22  ;;  %v3132_v56 = vld [vmem:[#allocation55_spill] sm:$0xff]  ;;  %v3133_v62 = vld [vmem:[#allocation56_spill] sm:$0xff] }
 0x6d9   :  { %2098 = vtanh.f32 %v1621_v41 }
 0x6da   :  { %2100 = vtanh.f32 %v1628_v59  ;;  %v1636_v1 = vmul.f32 0.5, %v1624_v2  ;;  %v1646_v12 = vmul.f32 0.5, %v1626_v23 }
 0x6dc   :  { %2102 = vtanh.f32 %v1636_v1 }
 0x6dd   :  { %2104 = vtanh.f32 %v1625_v3  ;;  %v3134_v3 = vld [vmem:[#allocation54_spill] sm:$0xff] }
 0x6de   :  { %2106 = vtanh.f32 %v1645_v11 }
 0x6df   :  { %2108 = vtanh.f32 %v1646_v12 }
 0x6e3   :  { %v2095_v8 = vpop.eup %2094 }
 0x6e4   :  { %v1631_v24 = vmul.f32 0.5, %v2095_v8 }
 0x6e5   :  { %v2097_v26 = vpop.eup %2096 }
 0x6e6   :  { %v2099_v63 = vpop.eup %2098  ;;  %v1633_v31 = vadd.f32 0.5, %v1631_v24  ;;  %v1639_v7 = vmul.f32 0.5, %v2097_v26 }
 0x6e7   :  { %v2101_v45 = vpop.eup %2100 }
 0x6e8   :  { %v1641_v58 = vadd.f32 0.5, %v1639_v7  ;;  %v1655_v48 = vmul.f32 %v2099_v63, %v1633_v31  ;;  %v1632_v46 = vmul.f32 0.5, %v2101_v45 }
 0x6e9   :  { %v2103_v10 = vpop.eup %2102 }
 0x6ea   :  { %v1653_v9 = vmul.f32 %v1641_v58, %v2959_v19  ;;  %v1634_v49 = vadd.f32 0.5, %v1632_v46  ;;  %v1640_v43 = vmul.f32 0.5, %v2103_v10  ;;  %v2105_v50 = vpop.eup %2104 }
 0x6eb   :  { %v2107_v33 = vpop.eup %2106 }
 0x6ec   :  { %v1657_v55 = vadd.f32 %v1655_v48, %v1653_v9  ;;  %v1642_v13 = vadd.f32 0.5, %v1640_v43  ;;  %v1656_v18 = vmul.f32 %v2105_v50, %v1634_v49  ;;  %v2109_v5 = vpop.eup %2108  ;;  %v1649_v47 = vmul.f32 0.5, %v2107_v33 }
 0x6ed   :  { %v1650_v51 = vmul.f32 0.5, %v2109_v5 }
 0x6ee   :  { %v1654_v20 = vmul.f32 %v1642_v13, %v2963_v25  ;;  %2110 = vtanh.f32 %v1657_v55  ;;  %v1651_v19 = vadd.f32 0.5, %v1649_v47 }
 0x6ef   :  { %v1652_v17 = vadd.f32 0.5, %v1650_v51 }
 0x6f0   :  { %v3008_v54 = vadd.f32 %v1656_v18, %v1654_v20 }
 0x6f2   :  { %2112 = vtanh.f32 %v3008_v54 }
 0x6fb   :  { %v2111_v53 = vpop.eup %2110 }
 0x6fc   :  { %v1661_v27 = vmul.f32 %v2111_v53, %v1651_v19 }
 0x6ff   :  { %v2113_v16 = vpop.eup %2112 }
 0x700   :  { %v1662_v28 = vmul.f32 %v2113_v16, %v1652_v17 }
 0x702   :  { %v1674_v29 = vpack.c.bf16 %v1662_v28, %v1661_v27 }
 0x704   :  { %1708 = vmatmul.mubr.bf16.vlgmr.msra.gmra.mxu0 %v1674_v29  ;;  %1751 = vmatmul.mubr.bf16.vlgmr.msra.gmra.mxu1 %v1674_v29 }
 0x7c4   :  { %v1709_v30 = vpop.f32.mrf.mxu0  ;;  %v1752_v25 = vpop.f32.mrf.mxu1 }
 0x7c5   :  { %v1761_v14 = vadd.f32 %v1709_v30, %v3128_v52  ;;  %v1763_v39 = vadd.f32 %v1752_v25, %v3130_v38  ;;  %v1910_v30 = vld [vmem:[#allocation5] ss:$0 sm:$0xff] }
 0x7c6   :  { %v1711_v32 = vpop.f32.mrf.mxu0  ;;  %v1754_v34 = vpop.f32.mrf.mxu1 }
 0x7c7   :  { %v1769_v35 = vmul.f32 0.5, %v1761_v14  ;;  %v1762_v37 = vadd.f32 %v1711_v32, %v3129_v36  ;;  %v1764_v1 = vadd.f32 %v1754_v34, %v3134_v3 }
 0x7c8   :  { %v1713_v40 = vpop.f32.mrf.mxu0  ;;  %v1756_v0 = vpop.f32.mrf.mxu1 }
 0x7c9   :  { %2114 = vtanh.f32 %v1769_v35  ;;  %v1777_v41 = vmul.f32 0.5, %v1762_v37  ;;  %v1765_v61 = vadd.f32 %v1713_v40, %v3131_v42  ;;  %v1767_v2 = vadd.f32 %v1756_v0, %v3133_v62 }
 0x7ca   :  { %v1715_v15 = vpop.f32.mrf.mxu0  ;;  %v1758_v57 = vpop.f32.mrf.mxu1  ;;  %v1787_v44 = vmul.f32 0.5, %v1764_v1 }
 0x7cb   :  { %2116 = vtanh.f32 %v1777_v41  ;;  %v1770_v60 = vmul.f32 0.5, %v1765_v61  ;;  %v1766_v59 = vadd.f32 %v1715_v15, %v3132_v56  ;;  %v1768_v21 = vadd.f32 %v1758_v57, %v2634_v4 }
 0x7cc   :  { %2118 = vtanh.f32 %v1763_v39 }
 0x7cd   :  { %2120 = vtanh.f32 %v1770_v60  ;;  %v1778_v6 = vmul.f32 0.5, %v1766_v59  ;;  %v1788_v63 = vmul.f32 0.5, %v1768_v21 }
 0x7cf   :  { %2122 = vtanh.f32 %v1778_v6 }
 0x7d0   :  { %2124 = vtanh.f32 %v1767_v2 }
 0x7d1   :  { %2126 = vtanh.f32 %v1787_v44 }
 0x7d2   :  { %2128 = vtanh.f32 %v1788_v63 }
 0x7d6   :  { %v2115_v22 = vpop.eup %2114 }
 0x7d7   :  { %v1773_v23 = vmul.f32 0.5, %v2115_v22 }
 0x7d8   :  { %v2117_v8 = vpop.eup %2116 }
 0x7d9   :  { %v2119_v24 = vpop.eup %2118  ;;  %v1775_v26 = vadd.f32 0.5, %v1773_v23  ;;  %v1781_v11 = vmul.f32 0.5, %v2117_v8 }
 0x7da   :  { %v2121_v31 = vpop.eup %2120 }
 0x7db   :  { %v1783_v7 = vadd.f32 0.5, %v1781_v11  ;;  %v1797_v12 = vmul.f32 %v2119_v24, %v1775_v26  ;;  %v1774_v45 = vmul.f32 0.5, %v2121_v31 }
 0x7dc   :  { %v2123_v58 = vpop.eup %2122 }
 0x7dd   :  { %v1795_v48 = vmul.f32 %v1783_v7, %v1657_v55  ;;  %v1776_v46 = vadd.f32 0.5, %v1774_v45  ;;  %v1782_v10 = vmul.f32 0.5, %v2123_v58  ;;  %v2125_v9 = vpop.eup %2124  ;;  %v1909_v55 = vld [vmem:[%s3033_s4] ss:$0 sm:$0xff] }
 0x7de   :  { %v2127_v18 = vpop.eup %2126 }
 0x7df   :  { %v1799_v49 = vadd.f32 %v1797_v12, %v1795_v48  ;;  %v1784_v4 = vadd.f32 0.5, %v1782_v10  ;;  %v1798_v43 = vmul.f32 %v2125_v9, %v1776_v46  ;;  %v1791_v20 = vmul.f32 0.5, %v2127_v18  ;;  %v2129_v33 = vpop.eup %2128 }
 0x7e0   :  { %v1792_v5 = vmul.f32 0.5, %v2129_v33 }
 0x7e1   :  { %2130 = vtanh.f32 %v1799_v49  ;;  %v1796_v50 = vmul.f32 %v1784_v4, %v3008_v54  ;;  %v1793_v47 = vadd.f32 0.5, %v1791_v20 }
 0x7e2   :  { %v1794_v19 = vadd.f32 0.5, %v1792_v5 }
 0x7e3   :  { %v1800_v13 = vadd.f32 %v1798_v43, %v1796_v50 }
 0x7e5   :  { %2132 = vtanh.f32 %v1800_v13 }
 0x7ee   :  { %v2131_v51 = vpop.eup %2130 }
 0x7ef   :  { %v1803_v53 = vmul.f32 %v2131_v51, %v1793_v47 }
 0x7f1   :  { %v1812_v17 = vmax.f32 %v1803_v53, 0.0 }
 0x7f2   :  { %v2133_v16 = vpop.eup %2132 }
 0x7f3   :  { %v1821_v27 = vmul.f32 %v1909_v55, %v1812_v17  ;;  %v1804_v28 = vmul.f32 %v2133_v16, %v1794_v19 }
 0x7f5   :  { %1823 = vadd.xlane.f32.xlu0 %v1821_v27  ;;  %v1813_v54 = vmax.f32 %v1804_v28, 0.0 }
 0x7f7   :  { %v1822_v29 = vmul.f32 %v1909_v55, %v1813_v54 }
 0x7f9   :  { %1825 = vadd.xlane.f32.xlu0 %v1822_v29 }
 0x87e   :  { %v1824_v25 = vpop.xlane.xlu0 %1823 }
 0x87f   :  { %v1834_v52 = vadd.f32 %v1910_v30, %v1824_v25 }
 0x881   :  { %1837 = vst.msk [vmem:[%s3035_s6] sm:$0xff] %vm1836_vm2, %v1834_v52 }
 0x882   :  { %v1826_v14 = vpop.xlane.xlu0 %1825 }
 0x883   :  { %v1835_v32 = vadd.f32 %v1910_v30, %v1826_v14 }
 0x885   :  { %1838 = vst.msk [vmem:[%s3035_s6 + $0x8] sm:$0xff] %vm1836_vm2, %v1835_v32 }
 0x886   :  { %1843 = vsyncpa [#allocation7], 1 }

</bundles_post_ra>
